<compile_context>
chip_gen: v7x
topology: tpu7x:2x2x1
jax: 0.10.0
libtpu: 0.0.40
codegen_flags: <defaults>
</compile_context>

<pallas_src>
import functools

import jax
import jax.numpy as jnp
from jax.experimental import pallas as pl
from jax.experimental.pallas import tpu as pltpu

# Squeezed batch dim (None is the equivalent legacy spelling).
_SQUEEZED = pl.Squeezed() if hasattr(pl, "Squeezed") else None


def _choose_tile_rows(H, W):
    """Pick tH = input rows per grid step.

    Constraints (so BlockSpecs are valid):
      * x block last dim  tH*W  must be a multiple of 128, or tH == H,
      * out block 2nd-to-last dim 2*tH must be a multiple of 8, or tH == H.
    Preference: smallest valid tile with >= 512 lanes of input per step
    (good DMA/compute overlap without blowing scoped VMEM); otherwise the
    largest valid tile (tH == H always qualifies).
    """
    divisors = [d for d in range(1, H + 1) if H % d == 0]
    valid = [d for d in divisors
             if ((d * W) % 128 == 0 or d == H) and ((2 * d) % 8 == 0 or d == H)]
    for d in valid:
        if d * W >= 512:
            return d
    return valid[-1]


def _upconv_kernel(w_ref, b_ref, e_ref, x_ref, o_ref, *, tile_rows, width, cout):
    # w_ref : (4*Cout, Cin)      rows ordered (kw, kh, o)   -- resident
    # b_ref : (2*Cout, 1)        bias replicated over kh    -- resident
    # e_ref : (2, W, 2W)         e_ref[kw, w, 2w+kw] = 1    -- resident
    # x_ref : (Cin, tH*W)        lane-dense flat spatial tile
    # o_ref : (Cout, 2*tH, 2W)   final-layout output tile (already interleaved)
    x = x_ref[...]
    w = w_ref[...]
    # One big lane-dense channel-mixing matmul for all 4 taps.
    y = jnp.dot(w, x, preferred_element_type=jnp.float32)      # (4*Cout, tH*W)
    e0 = e_ref[0]                                               # (W, 2W)
    e1 = e_ref[1]
    bias = b_ref[...]                                           # (2*Cout, 1)

    # Per input row: MXU "dilation" matmuls place kw=0 taps in even output
    # columns and kw=1 taps in odd ones; rows [0:Cout] are kh=0, [Cout:2Cout]
    # are kh=1, stored to the matching interleaved output rows.
    for r in range(tile_rows):
        yr = y[:, r * width:(r + 1) * width]                    # (4*Cout, W)
        d = (jnp.dot(yr[:2 * cout], e0, preferred_element_type=jnp.float32) +
             jnp.dot(yr[2 * cout:], e1, preferred_element_type=jnp.float32))
        d = d + bias                                            # (2*Cout, 2W)
        o_ref[:, 2 * r, :] = d[:cout].astype(o_ref.dtype)       # kh = 0 row
        o_ref[:, 2 * r + 1, :] = d[cout:].astype(o_ref.dtype)   # kh = 1 row


def up_forward(x, w, b):
    """ConvTranspose2d(in_ch, out_ch, kernel=2, stride=2) forward.

    x: (N, Cin, H, W)
    w: (Cin, Cout, 2, 2)   (PyTorch ConvTranspose2d weight layout)
    b: (Cout,)
    returns: (N, Cout, 2H, 2W)
    """
    N, Cin, H, W = x.shape
    Cout = w.shape[1]
    S = H * W
    tH = _choose_tile_rows(H, W)

    x_flat = x.reshape(N, Cin, S)                               # free reshape
    # Row ((kw*2 + kh)*Cout + o) of w_mat holds weight[:, o, kh, kw].
    w_mat = jnp.transpose(w, (3, 2, 1, 0)).reshape(4 * Cout, Cin)
    b_mat = jnp.tile(b, 2).reshape(2 * Cout, 1)                 # bias for (kh, o) rows
    # Lane-dilation matrices: e_kw[w, 2w+kw] = 1.
    cols = jnp.arange(2 * W)
    rows2 = 2 * jnp.arange(W)
    e0 = (cols[None, :] == rows2[:, None]).astype(x.dtype)
    e1 = (cols[None, :] == (rows2[:, None] + 1)).astype(x.dtype)
    e_stack = jnp.stack([e0, e1], axis=0)                       # (2, W, 2W)

    grid = (N, H // tH)

    out = pl.pallas_call(
        functools.partial(_upconv_kernel, tile_rows=tH, width=W, cout=Cout),
        out_shape=jax.ShapeDtypeStruct((N, Cout, 2 * H, 2 * W), x.dtype),
        grid_spec=pltpu.PrefetchScalarGridSpec(
            num_scalar_prefetch=0,
            grid=grid,
            in_specs=[
                pl.BlockSpec((4 * Cout, Cin), lambda n, h: (0, 0)),       # weights
                pl.BlockSpec((2 * Cout, 1), lambda n, h: (0, 0)),         # bias
                pl.BlockSpec((2, W, 2 * W), lambda n, h: (0, 0, 0)),      # dilation mats
                pl.BlockSpec((_SQUEEZED, Cin, tH * W),
                             lambda n, h: (n, 0, h)),                     # x tile
            ],
            out_specs=pl.BlockSpec((_SQUEEZED, Cout, 2 * tH, 2 * W),
                                   lambda n, h: (n, 0, h, 0)),            # final layout
        ),
        compiler_params=pltpu.CompilerParams(
            dimension_semantics=("parallel", "parallel"),
            vmem_limit_bytes=48 * 1024 * 1024,
        ),
        cost_estimate=pl.CostEstimate(
            flops=8 * N * Cout * Cin * S + 16 * N * Cout * S * W,
            transcendentals=0,
            bytes_accessed=4 * (N * Cin * S + 4 * N * Cout * S
                                + 4 * Cout * Cin + 4 * W * W + 2 * Cout),
        ),
    )(w_mat, b_mat, e_stack, x_flat)
    return out


def reference(x, w, b):
    """Transposed conv via lhs-dilated regular conv (independent check)."""
    w_flip = jnp.flip(w, axis=(2, 3))                 # flip spatial taps
    w_oihw = jnp.transpose(w_flip, (1, 0, 2, 3))      # (Cout, Cin, 2, 2)
    y = jax.lax.conv_general_dilated(
        x, w_oihw,
        window_strides=(1, 1),
        padding=((1, 1), (1, 1)),
        lhs_dilation=(2, 2),
        dimension_numbers=("NCHW", "OIHW", "NCHW"))
    return y + b[None, :, None, None]


if __name__ == "__main__":
    key = jax.random.PRNGKey(0)
    kx, kw_, kb = jax.random.split(key, 3)

    N, C, H, W = 2, 4, 16, 16                      # in_ch = out_ch = 4
    x = jax.random.normal(kx, (N, C, H, W), dtype=jnp.float32)
    # ConvTranspose2d(in_ch, in_ch, 2, stride=2) weight/bias, deterministic init.
    w = jax.random.normal(kw_, (C, C, 2, 2), dtype=jnp.float32) * 0.1
    b = jax.random.normal(kb, (C,), dtype=jnp.float32) * 0.1

    out = jax.block_until_ready(up_forward(x, w, b))
    ref = jax.block_until_ready(reference(x, w, b))

    assert out.shape == (N, C, 2 * H, 2 * W), out.shape
    assert jnp.allclose(out, ref, atol=1e-5, rtol=1e-5), (
        f"max abs diff {jnp.max(jnp.abs(out - ref))}")

    print("KERNEL_OK")
</pallas_src>

<mosaic_0001>
module attributes {stable_mosaic.version = 11 : i64} {
  func.func @_upconv_kernel(%arg0: i32, %arg1: i32, %arg2: memref<16x4xf32, #tpu.memory_space<vmem>>, %arg3: memref<8x1xf32, #tpu.memory_space<vmem>>, %arg4: memref<2x16x32xf32, #tpu.memory_space<vmem>>, %arg5: memref<1x4x256xf32, #tpu.memory_space<vmem>>, %arg6: memref<1x4x32x32xf32, #tpu.memory_space<vmem>>) attributes {dimension_semantics = [#tpu.dimension_semantics<parallel>, #tpu.dimension_semantics<parallel>], iteration_bounds = array<i64: 2, 1>, scalar_prefetch = 0 : i64, scratch_operands = 0 : i64, tpu.core_type = #tpu.core_type<tc>, window_params = [{pipeline_mode = #tpu.pipeline_mode<synchronous>, transform_indices = @transform_0, window_bounds = array<i64: 16, 4>}, {pipeline_mode = #tpu.pipeline_mode<synchronous>, transform_indices = @transform_1, window_bounds = array<i64: 8, 1>}, {pipeline_mode = #tpu.pipeline_mode<synchronous>, transform_indices = @transform_2, window_bounds = array<i64: 2, 16, 32>}, {transform_indices = @transform_3, window_bounds = array<i64: 1, 4, 256>}, {transform_indices = @transform_4, window_bounds = array<i64: 1, 4, 32, 32>}]} {
    %c0 = arith.constant 0 : index
    %c0_0 = arith.constant 0 : index
    %c0_1 = arith.constant 0 : index
    %0 = vector.load %arg5[%c0, %c0_0, %c0_1] : memref<1x4x256xf32, #tpu.memory_space<vmem>>, vector<1x4x256xf32>
    %1 = vector.shape_cast %0 : vector<1x4x256xf32> to vector<4x256xf32>
    %c0_2 = arith.constant 0 : index
    %c0_3 = arith.constant 0 : index
    %2 = vector.load %arg2[%c0_2, %c0_3] : memref<16x4xf32, #tpu.memory_space<vmem>>, vector<16x4xf32>
    %cst = arith.constant dense<0.000000e+00> : vector<16x256xf32>
    %3 = tpu.matmul %2, %1, %cst {dimension_numbers = #tpu.dot_dimension_numbers<[1], [0], [0], [1], [0, 0, 1, 1], [], []>} : vector<16x4xf32>, vector<4x256xf32>, vector<16x256xf32> -> vector<16x256xf32>
    %c0_4 = arith.constant 0 : index
    %c0_5 = arith.constant 0 : index
    %c0_6 = arith.constant 0 : index
    %4 = vector.load %arg4[%c0_4, %c0_5, %c0_6] : memref<2x16x32xf32, #tpu.memory_space<vmem>>, vector<1x16x32xf32>
    %5 = vector.shape_cast %4 : vector<1x16x32xf32> to vector<16x32xf32>
    %c1 = arith.constant 1 : index
    %c0_7 = arith.constant 0 : index
    %c0_8 = arith.constant 0 : index
    %6 = vector.load %arg4[%c1, %c0_7, %c0_8] : memref<2x16x32xf32, #tpu.memory_space<vmem>>, vector<1x16x32xf32>
    %7 = vector.shape_cast %6 : vector<1x16x32xf32> to vector<16x32xf32>
    %c0_9 = arith.constant 0 : index
    %c0_10 = arith.constant 0 : index
    %8 = vector.load %arg3[%c0_9, %c0_10] : memref<8x1xf32, #tpu.memory_space<vmem>>, vector<8x1xf32>
    %9 = vector.extract_strided_slice %3 {offsets = [0, 0], sizes = [16, 16], strides = [1, 1]} : vector<16x256xf32> to vector<16x16xf32>
    %10 = vector.extract_strided_slice %9 {offsets = [0, 0], sizes = [8, 16], strides = [1, 1]} : vector<16x16xf32> to vector<8x16xf32>
    %cst_11 = arith.constant dense<0.000000e+00> : vector<8x32xf32>
    %11 = tpu.matmul %10, %5, %cst_11 {dimension_numbers = #tpu.dot_dimension_numbers<[1], [0], [0], [1], [0, 0, 1, 1], [], []>} : vector<8x16xf32>, vector<16x32xf32>, vector<8x32xf32> -> vector<8x32xf32>
    %12 = vector.extract_strided_slice %9 {offsets = [8, 0], sizes = [8, 16], strides = [1, 1]} : vector<16x16xf32> to vector<8x16xf32>
    %cst_12 = arith.constant dense<0.000000e+00> : vector<8x32xf32>
    %13 = tpu.matmul %12, %7, %cst_12 {dimension_numbers = #tpu.dot_dimension_numbers<[1], [0], [0], [1], [0, 0, 1, 1], [], []>} : vector<8x16xf32>, vector<16x32xf32>, vector<8x32xf32> -> vector<8x32xf32>
    %14 = arith.addf %11, %13 : vector<8x32xf32>
    %15 = vector.broadcast %8 : vector<8x1xf32> to vector<8x32xf32>
    %16 = arith.addf %14, %15 : vector<8x32xf32>
    %17 = vector.extract_strided_slice %16 {offsets = [0, 0], sizes = [4, 32], strides = [1, 1]} : vector<8x32xf32> to vector<4x32xf32>
    %c0_13 = arith.constant 0 : index
    %c0_14 = arith.constant 0 : index
    %c0_15 = arith.constant 0 : index
    %c0_16 = arith.constant 0 : index
    %18 = vector.load %arg6[%c0_13, %c0_14, %c0_15, %c0_16] : memref<1x4x32x32xf32, #tpu.memory_space<vmem>>, vector<1x4x1x32xf32>
    %19 = vector.shape_cast %18 : vector<1x4x1x32xf32> to vector<4x32xf32>
    %20 = vector.shape_cast %17 : vector<4x32xf32> to vector<1x4x1x32xf32>
    tpu.vector_store %arg6[%c0_13, %c0_14, %c0_15, %c0_16], %20 {strides = array<i32>} : memref<1x4x32x32xf32, #tpu.memory_space<vmem>>, vector<1x4x1x32xf32>,
    %21 = vector.extract_strided_slice %16 {offsets = [4, 0], sizes = [4, 32], strides = [1, 1]} : vector<8x32xf32> to vector<4x32xf32>
    %c0_17 = arith.constant 0 : index
    %c0_18 = arith.constant 0 : index
    %c1_19 = arith.constant 1 : index
    %c0_20 = arith.constant 0 : index
    %22 = vector.load %arg6[%c0_17, %c0_18, %c1_19, %c0_20] : memref<1x4x32x32xf32, #tpu.memory_space<vmem>>, vector<1x4x1x32xf32>
    %23 = vector.shape_cast %22 : vector<1x4x1x32xf32> to vector<4x32xf32>
    %24 = vector.shape_cast %21 : vector<4x32xf32> to vector<1x4x1x32xf32>
    tpu.vector_store %arg6[%c0_17, %c0_18, %c1_19, %c0_20], %24 {strides = array<i32>} : memref<1x4x32x32xf32, #tpu.memory_space<vmem>>, vector<1x4x1x32xf32>,
    %25 = vector.extract_strided_slice %3 {offsets = [0, 16], sizes = [16, 16], strides = [1, 1]} : vector<16x256xf32> to vector<16x16xf32>
    %26 = vector.extract_strided_slice %25 {offsets = [0, 0], sizes = [8, 16], strides = [1, 1]} : vector<16x16xf32> to vector<8x16xf32>
    %cst_21 = arith.constant dense<0.000000e+00> : vector<8x32xf32>
    %27 = tpu.matmul %26, %5, %cst_21 {dimension_numbers = #tpu.dot_dimension_numbers<[1], [0], [0], [1], [0, 0, 1, 1], [], []>} : vector<8x16xf32>, vector<16x32xf32>, vector<8x32xf32> -> vector<8x32xf32>
    %28 = vector.extract_strided_slice %25 {offsets = [8, 0], sizes = [8, 16], strides = [1, 1]} : vector<16x16xf32> to vector<8x16xf32>
    %cst_22 = arith.constant dense<0.000000e+00> : vector<8x32xf32>
    %29 = tpu.matmul %28, %7, %cst_22 {dimension_numbers = #tpu.dot_dimension_numbers<[1], [0], [0], [1], [0, 0, 1, 1], [], []>} : vector<8x16xf32>, vector<16x32xf32>, vector<8x32xf32> -> vector<8x32xf32>
    %30 = arith.addf %27, %29 : vector<8x32xf32>
    %31 = vector.broadcast %8 : vector<8x1xf32> to vector<8x32xf32>
    %32 = arith.addf %30, %31 : vector<8x32xf32>
    %33 = vector.extract_strided_slice %32 {offsets = [0, 0], sizes = [4, 32], strides = [1, 1]} : vector<8x32xf32> to vector<4x32xf32>
    %c0_23 = arith.constant 0 : index
    %c0_24 = arith.constant 0 : index
    %c2 = arith.constant 2 : index
    %c0_25 = arith.constant 0 : index
    %34 = vector.load %arg6[%c0_23, %c0_24, %c2, %c0_25] : memref<1x4x32x32xf32, #tpu.memory_space<vmem>>, vector<1x4x1x32xf32>
    %35 = vector.shape_cast %34 : vector<1x4x1x32xf32> to vector<4x32xf32>
    %36 = vector.shape_cast %33 : vector<4x32xf32> to vector<1x4x1x32xf32>
    tpu.vector_store %arg6[%c0_23, %c0_24, %c2, %c0_25], %36 {strides = array<i32>} : memref<1x4x32x32xf32, #tpu.memory_space<vmem>>, vector<1x4x1x32xf32>,
    %37 = vector.extract_strided_slice %32 {offsets = [4, 0], sizes = [4, 32], strides = [1, 1]} : vector<8x32xf32> to vector<4x32xf32>
    %c0_26 = arith.constant 0 : index
    %c0_27 = arith.constant 0 : index
    %c3 = arith.constant 3 : index
    %c0_28 = arith.constant 0 : index
    %38 = vector.load %arg6[%c0_26, %c0_27, %c3, %c0_28] : memref<1x4x32x32xf32, #tpu.memory_space<vmem>>, vector<1x4x1x32xf32>
    %39 = vector.shape_cast %38 : vector<1x4x1x32xf32> to vector<4x32xf32>
    %40 = vector.shape_cast %37 : vector<4x32xf32> to vector<1x4x1x32xf32>
    tpu.vector_store %arg6[%c0_26, %c0_27, %c3, %c0_28], %40 {strides = array<i32>} : memref<1x4x32x32xf32, #tpu.memory_space<vmem>>, vector<1x4x1x32xf32>,
    %41 = vector.extract_strided_slice %3 {offsets = [0, 32], sizes = [16, 16], strides = [1, 1]} : vector<16x256xf32> to vector<16x16xf32>
    %42 = vector.extract_strided_slice %41 {offsets = [0, 0], sizes = [8, 16], strides = [1, 1]} : vector<16x16xf32> to vector<8x16xf32>
    %cst_29 = arith.constant dense<0.000000e+00> : vector<8x32xf32>
    %43 = tpu.matmul %42, %5, %cst_29 {dimension_numbers = #tpu.dot_dimension_numbers<[1], [0], [0], [1], [0, 0, 1, 1], [], []>} : vector<8x16xf32>, vector<16x32xf32>, vector<8x32xf32> -> vector<8x32xf32>
    %44 = vector.extract_strided_slice %41 {offsets = [8, 0], sizes = [8, 16], strides = [1, 1]} : vector<16x16xf32> to vector<8x16xf32>
    %cst_30 = arith.constant dense<0.000000e+00> : vector<8x32xf32>
    %45 = tpu.matmul %44, %7, %cst_30 {dimension_numbers = #tpu.dot_dimension_numbers<[1], [0], [0], [1], [0, 0, 1, 1], [], []>} : vector<8x16xf32>, vector<16x32xf32>, vector<8x32xf32> -> vector<8x32xf32>
    %46 = arith.addf %43, %45 : vector<8x32xf32>
    %47 = vector.broadcast %8 : vector<8x1xf32> to vector<8x32xf32>
    %48 = arith.addf %46, %47 : vector<8x32xf32>
    %49 = vector.extract_strided_slice %48 {offsets = [0, 0], sizes = [4, 32], strides = [1, 1]} : vector<8x32xf32> to vector<4x32xf32>
    %c0_31 = arith.constant 0 : index
    %c0_32 = arith.constant 0 : index
    %c4 = arith.constant 4 : index
    %c0_33 = arith.constant 0 : index
    %50 = vector.load %arg6[%c0_31, %c0_32, %c4, %c0_33] : memref<1x4x32x32xf32, #tpu.memory_space<vmem>>, vector<1x4x1x32xf32>
    %51 = vector.shape_cast %50 : vector<1x4x1x32xf32> to vector<4x32xf32>
    %52 = vector.shape_cast %49 : vector<4x32xf32> to vector<1x4x1x32xf32>
    tpu.vector_store %arg6[%c0_31, %c0_32, %c4, %c0_33], %52 {strides = array<i32>} : memref<1x4x32x32xf32, #tpu.memory_space<vmem>>, vector<1x4x1x32xf32>,
    %53 = vector.extract_strided_slice %48 {offsets = [4, 0], sizes = [4, 32], strides = [1, 1]} : vector<8x32xf32> to vector<4x32xf32>
    %c0_34 = arith.constant 0 : index
    %c0_35 = arith.constant 0 : index
    %c5 = arith.constant 5 : index
    %c0_36 = arith.constant 0 : index
    %54 = vector.load %arg6[%c0_34, %c0_35, %c5, %c0_36] : memref<1x4x32x32xf32, #tpu.memory_space<vmem>>, vector<1x4x1x32xf32>
    %55 = vector.shape_cast %54 : vector<1x4x1x32xf32> to vector<4x32xf32>
    %56 = vector.shape_cast %53 : vector<4x32xf32> to vector<1x4x1x32xf32>
    tpu.vector_store %arg6[%c0_34, %c0_35, %c5, %c0_36], %56 {strides = array<i32>} : memref<1x4x32x32xf32, #tpu.memory_space<vmem>>, vector<1x4x1x32xf32>,
    %57 = vector.extract_strided_slice %3 {offsets = [0, 48], sizes = [16, 16], strides = [1, 1]} : vector<16x256xf32> to vector<16x16xf32>
    %58 = vector.extract_strided_slice %57 {offsets = [0, 0], sizes = [8, 16], strides = [1, 1]} : vector<16x16xf32> to vector<8x16xf32>
    %cst_37 = arith.constant dense<0.000000e+00> : vector<8x32xf32>
    %59 = tpu.matmul %58, %5, %cst_37 {dimension_numbers = #tpu.dot_dimension_numbers<[1], [0], [0], [1], [0, 0, 1, 1], [], []>} : vector<8x16xf32>, vector<16x32xf32>, vector<8x32xf32> -> vector<8x32xf32>
    %60 = vector.extract_strided_slice %57 {offsets = [8, 0], sizes = [8, 16], strides = [1, 1]} : vector<16x16xf32> to vector<8x16xf32>
    %cst_38 = arith.constant dense<0.000000e+00> : vector<8x32xf32>
    %61 = tpu.matmul %60, %7, %cst_38 {dimension_numbers = #tpu.dot_dimension_numbers<[1], [0], [0], [1], [0, 0, 1, 1], [], []>} : vector<8x16xf32>, vector<16x32xf32>, vector<8x32xf32> -> vector<8x32xf32>
    %62 = arith.addf %59, %61 : vector<8x32xf32>
    %63 = vector.broadcast %8 : vector<8x1xf32> to vector<8x32xf32>
    %64 = arith.addf %62, %63 : vector<8x32xf32>
    %65 = vector.extract_strided_slice %64 {offsets = [0, 0], sizes = [4, 32], strides = [1, 1]} : vector<8x32xf32> to vector<4x32xf32>
    %c0_39 = arith.constant 0 : index
    %c0_40 = arith.constant 0 : index
    %c6 = arith.constant 6 : index
    %c0_41 = arith.constant 0 : index
    %66 = vector.load %arg6[%c0_39, %c0_40, %c6, %c0_41] : memref<1x4x32x32xf32, #tpu.memory_space<vmem>>, vector<1x4x1x32xf32>
    %67 = vector.shape_cast %66 : vector<1x4x1x32xf32> to vector<4x32xf32>
    %68 = vector.shape_cast %65 : vector<4x32xf32> to vector<1x4x1x32xf32>
    tpu.vector_store %arg6[%c0_39, %c0_40, %c6, %c0_41], %68 {strides = array<i32>} : memref<1x4x32x32xf32, #tpu.memory_space<vmem>>, vector<1x4x1x32xf32>,
    %69 = vector.extract_strided_slice %64 {offsets = [4, 0], sizes = [4, 32], strides = [1, 1]} : vector<8x32xf32> to vector<4x32xf32>
    %c0_42 = arith.constant 0 : index
    %c0_43 = arith.constant 0 : index
    %c7 = arith.constant 7 : index
    %c0_44 = arith.constant 0 : index
    %70 = vector.load %arg6[%c0_42, %c0_43, %c7, %c0_44] : memref<1x4x32x32xf32, #tpu.memory_space<vmem>>, vector<1x4x1x32xf32>
    %71 = vector.shape_cast %70 : vector<1x4x1x32xf32> to vector<4x32xf32>
    %72 = vector.shape_cast %69 : vector<4x32xf32> to vector<1x4x1x32xf32>
    tpu.vector_store %arg6[%c0_42, %c0_43, %c7, %c0_44], %72 {strides = array<i32>} : memref<1x4x32x32xf32, #tpu.memory_space<vmem>>, vector<1x4x1x32xf32>,
    %73 = vector.extract_strided_slice %3 {offsets = [0, 64], sizes = [16, 16], strides = [1, 1]} : vector<16x256xf32> to vector<16x16xf32>
    %74 = vector.extract_strided_slice %73 {offsets = [0, 0], sizes = [8, 16], strides = [1, 1]} : vector<16x16xf32> to vector<8x16xf32>
    %cst_45 = arith.constant dense<0.000000e+00> : vector<8x32xf32>
    %75 = tpu.matmul %74, %5, %cst_45 {dimension_numbers = #tpu.dot_dimension_numbers<[1], [0], [0], [1], [0, 0, 1, 1], [], []>} : vector<8x16xf32>, vector<16x32xf32>, vector<8x32xf32> -> vector<8x32xf32>
    %76 = vector.extract_strided_slice %73 {offsets = [8, 0], sizes = [8, 16], strides = [1, 1]} : vector<16x16xf32> to vector<8x16xf32>
    %cst_46 = arith.constant dense<0.000000e+00> : vector<8x32xf32>
    %77 = tpu.matmul %76, %7, %cst_46 {dimension_numbers = #tpu.dot_dimension_numbers<[1], [0], [0], [1], [0, 0, 1, 1], [], []>} : vector<8x16xf32>, vector<16x32xf32>, vector<8x32xf32> -> vector<8x32xf32>
    %78 = arith.addf %75, %77 : vector<8x32xf32>
    %79 = vector.broadcast %8 : vector<8x1xf32> to vector<8x32xf32>
    %80 = arith.addf %78, %79 : vector<8x32xf32>
    %81 = vector.extract_strided_slice %80 {offsets = [0, 0], sizes = [4, 32], strides = [1, 1]} : vector<8x32xf32> to vector<4x32xf32>
    %c0_47 = arith.constant 0 : index
    %c0_48 = arith.constant 0 : index
    %c8 = arith.constant 8 : index
    %c0_49 = arith.constant 0 : index
    %82 = vector.load %arg6[%c0_47, %c0_48, %c8, %c0_49] : memref<1x4x32x32xf32, #tpu.memory_space<vmem>>, vector<1x4x1x32xf32>
    %83 = vector.shape_cast %82 : vector<1x4x1x32xf32> to vector<4x32xf32>
    %84 = vector.shape_cast %81 : vector<4x32xf32> to vector<1x4x1x32xf32>
    tpu.vector_store %arg6[%c0_47, %c0_48, %c8, %c0_49], %84 {strides = array<i32>} : memref<1x4x32x32xf32, #tpu.memory_space<vmem>>, vector<1x4x1x32xf32>,
    %85 = vector.extract_strided_slice %80 {offsets = [4, 0], sizes = [4, 32], strides = [1, 1]} : vector<8x32xf32> to vector<4x32xf32>
    %c0_50 = arith.constant 0 : index
    %c0_51 = arith.constant 0 : index
    %c9 = arith.constant 9 : index
    %c0_52 = arith.constant 0 : index
    %86 = vector.load %arg6[%c0_50, %c0_51, %c9, %c0_52] : memref<1x4x32x32xf32, #tpu.memory_space<vmem>>, vector<1x4x1x32xf32>
    %87 = vector.shape_cast %86 : vector<1x4x1x32xf32> to vector<4x32xf32>
    %88 = vector.shape_cast %85 : vector<4x32xf32> to vector<1x4x1x32xf32>
    tpu.vector_store %arg6[%c0_50, %c0_51, %c9, %c0_52], %88 {strides = array<i32>} : memref<1x4x32x32xf32, #tpu.memory_space<vmem>>, vector<1x4x1x32xf32>,
    %89 = vector.extract_strided_slice %3 {offsets = [0, 80], sizes = [16, 16], strides = [1, 1]} : vector<16x256xf32> to vector<16x16xf32>
    %90 = vector.extract_strided_slice %89 {offsets = [0, 0], sizes = [8, 16], strides = [1, 1]} : vector<16x16xf32> to vector<8x16xf32>
    %cst_53 = arith.constant dense<0.000000e+00> : vector<8x32xf32>
    %91 = tpu.matmul %90, %5, %cst_53 {dimension_numbers = #tpu.dot_dimension_numbers<[1], [0], [0], [1], [0, 0, 1, 1], [], []>} : vector<8x16xf32>, vector<16x32xf32>, vector<8x32xf32> -> vector<8x32xf32>
    %92 = vector.extract_strided_slice %89 {offsets = [8, 0], sizes = [8, 16], strides = [1, 1]} : vector<16x16xf32> to vector<8x16xf32>
    %cst_54 = arith.constant dense<0.000000e+00> : vector<8x32xf32>
    %93 = tpu.matmul %92, %7, %cst_54 {dimension_numbers = #tpu.dot_dimension_numbers<[1], [0], [0], [1], [0, 0, 1, 1], [], []>} : vector<8x16xf32>, vector<16x32xf32>, vector<8x32xf32> -> vector<8x32xf32>
    %94 = arith.addf %91, %93 : vector<8x32xf32>
    %95 = vector.broadcast %8 : vector<8x1xf32> to vector<8x32xf32>
    %96 = arith.addf %94, %95 : vector<8x32xf32>
    %97 = vector.extract_strided_slice %96 {offsets = [0, 0], sizes = [4, 32], strides = [1, 1]} : vector<8x32xf32> to vector<4x32xf32>
    %c0_55 = arith.constant 0 : index
    %c0_56 = arith.constant 0 : index
    %c10 = arith.constant 10 : index
    %c0_57 = arith.constant 0 : index
    %98 = vector.load %arg6[%c0_55, %c0_56, %c10, %c0_57] : memref<1x4x32x32xf32, #tpu.memory_space<vmem>>, vector<1x4x1x32xf32>
    %99 = vector.shape_cast %98 : vector<1x4x1x32xf32> to vector<4x32xf32>
    %100 = vector.shape_cast %97 : vector<4x32xf32> to vector<1x4x1x32xf32>
    tpu.vector_store %arg6[%c0_55, %c0_56, %c10, %c0_57], %100 {strides = array<i32>} : memref<1x4x32x32xf32, #tpu.memory_space<vmem>>, vector<1x4x1x32xf32>,
    %101 = vector.extract_strided_slice %96 {offsets = [4, 0], sizes = [4, 32], strides = [1, 1]} : vector<8x32xf32> to vector<4x32xf32>
    %c0_58 = arith.constant 0 : index
    %c0_59 = arith.constant 0 : index
    %c11 = arith.constant 11 : index
    %c0_60 = arith.constant 0 : index
    %102 = vector.load %arg6[%c0_58, %c0_59, %c11, %c0_60] : memref<1x4x32x32xf32, #tpu.memory_space<vmem>>, vector<1x4x1x32xf32>
    %103 = vector.shape_cast %102 : vector<1x4x1x32xf32> to vector<4x32xf32>
    %104 = vector.shape_cast %101 : vector<4x32xf32> to vector<1x4x1x32xf32>
    tpu.vector_store %arg6[%c0_58, %c0_59, %c11, %c0_60], %104 {strides = array<i32>} : memref<1x4x32x32xf32, #tpu.memory_space<vmem>>, vector<1x4x1x32xf32>,
    %105 = vector.extract_strided_slice %3 {offsets = [0, 96], sizes = [16, 16], strides = [1, 1]} : vector<16x256xf32> to vector<16x16xf32>
    %106 = vector.extract_strided_slice %105 {offsets = [0, 0], sizes = [8, 16], strides = [1, 1]} : vector<16x16xf32> to vector<8x16xf32>
    %cst_61 = arith.constant dense<0.000000e+00> : vector<8x32xf32>
    %107 = tpu.matmul %106, %5, %cst_61 {dimension_numbers = #tpu.dot_dimension_numbers<[1], [0], [0], [1], [0, 0, 1, 1], [], []>} : vector<8x16xf32>, vector<16x32xf32>, vector<8x32xf32> -> vector<8x32xf32>
    %108 = vector.extract_strided_slice %105 {offsets = [8, 0], sizes = [8, 16], strides = [1, 1]} : vector<16x16xf32> to vector<8x16xf32>
    %cst_62 = arith.constant dense<0.000000e+00> : vector<8x32xf32>
    %109 = tpu.matmul %108, %7, %cst_62 {dimension_numbers = #tpu.dot_dimension_numbers<[1], [0], [0], [1], [0, 0, 1, 1], [], []>} : vector<8x16xf32>, vector<16x32xf32>, vector<8x32xf32> -> vector<8x32xf32>
    %110 = arith.addf %107, %109 : vector<8x32xf32>
    %111 = vector.broadcast %8 : vector<8x1xf32> to vector<8x32xf32>
    %112 = arith.addf %110, %111 : vector<8x32xf32>
    %113 = vector.extract_strided_slice %112 {offsets = [0, 0], sizes = [4, 32], strides = [1, 1]} : vector<8x32xf32> to vector<4x32xf32>
    %c0_63 = arith.constant 0 : index
    %c0_64 = arith.constant 0 : index
    %c12 = arith.constant 12 : index
    %c0_65 = arith.constant 0 : index
    %114 = vector.load %arg6[%c0_63, %c0_64, %c12, %c0_65] : memref<1x4x32x32xf32, #tpu.memory_space<vmem>>, vector<1x4x1x32xf32>
    %115 = vector.shape_cast %114 : vector<1x4x1x32xf32> to vector<4x32xf32>
    %116 = vector.shape_cast %113 : vector<4x32xf32> to vector<1x4x1x32xf32>
    tpu.vector_store %arg6[%c0_63, %c0_64, %c12, %c0_65], %116 {strides = array<i32>} : memref<1x4x32x32xf32, #tpu.memory_space<vmem>>, vector<1x4x1x32xf32>,
    %117 = vector.extract_strided_slice %112 {offsets = [4, 0], sizes = [4, 32], strides = [1, 1]} : vector<8x32xf32> to vector<4x32xf32>
    %c0_66 = arith.constant 0 : index
    %c0_67 = arith.constant 0 : index
    %c13 = arith.constant 13 : index
    %c0_68 = arith.constant 0 : index
    %118 = vector.load %arg6[%c0_66, %c0_67, %c13, %c0_68] : memref<1x4x32x32xf32, #tpu.memory_space<vmem>>, vector<1x4x1x32xf32>
    %119 = vector.shape_cast %118 : vector<1x4x1x32xf32> to vector<4x32xf32>
    %120 = vector.shape_cast %117 : vector<4x32xf32> to vector<1x4x1x32xf32>
    tpu.vector_store %arg6[%c0_66, %c0_67, %c13, %c0_68], %120 {strides = array<i32>} : memref<1x4x32x32xf32, #tpu.memory_space<vmem>>, vector<1x4x1x32xf32>,
    %121 = vector.extract_strided_slice %3 {offsets = [0, 112], sizes = [16, 16], strides = [1, 1]} : vector<16x256xf32> to vector<16x16xf32>
    %122 = vector.extract_strided_slice %121 {offsets = [0, 0], sizes = [8, 16], strides = [1, 1]} : vector<16x16xf32> to vector<8x16xf32>
    %cst_69 = arith.constant dense<0.000000e+00> : vector<8x32xf32>
    %123 = tpu.matmul %122, %5, %cst_69 {dimension_numbers = #tpu.dot_dimension_numbers<[1], [0], [0], [1], [0, 0, 1, 1], [], []>} : vector<8x16xf32>, vector<16x32xf32>, vector<8x32xf32> -> vector<8x32xf32>
    %124 = vector.extract_strided_slice %121 {offsets = [8, 0], sizes = [8, 16], strides = [1, 1]} : vector<16x16xf32> to vector<8x16xf32>
    %cst_70 = arith.constant dense<0.000000e+00> : vector<8x32xf32>
    %125 = tpu.matmul %124, %7, %cst_70 {dimension_numbers = #tpu.dot_dimension_numbers<[1], [0], [0], [1], [0, 0, 1, 1], [], []>} : vector<8x16xf32>, vector<16x32xf32>, vector<8x32xf32> -> vector<8x32xf32>
    %126 = arith.addf %123, %125 : vector<8x32xf32>
    %127 = vector.broadcast %8 : vector<8x1xf32> to vector<8x32xf32>
    %128 = arith.addf %126, %127 : vector<8x32xf32>
    %129 = vector.extract_strided_slice %128 {offsets = [0, 0], sizes = [4, 32], strides = [1, 1]} : vector<8x32xf32> to vector<4x32xf32>
    %c0_71 = arith.constant 0 : index
    %c0_72 = arith.constant 0 : index
    %c14 = arith.constant 14 : index
    %c0_73 = arith.constant 0 : index
    %130 = vector.load %arg6[%c0_71, %c0_72, %c14, %c0_73] : memref<1x4x32x32xf32, #tpu.memory_space<vmem>>, vector<1x4x1x32xf32>
    %131 = vector.shape_cast %130 : vector<1x4x1x32xf32> to vector<4x32xf32>
    %132 = vector.shape_cast %129 : vector<4x32xf32> to vector<1x4x1x32xf32>
    tpu.vector_store %arg6[%c0_71, %c0_72, %c14, %c0_73], %132 {strides = array<i32>} : memref<1x4x32x32xf32, #tpu.memory_space<vmem>>, vector<1x4x1x32xf32>,
    %133 = vector.extract_strided_slice %128 {offsets = [4, 0], sizes = [4, 32], strides = [1, 1]} : vector<8x32xf32> to vector<4x32xf32>
    %c0_74 = arith.constant 0 : index
    %c0_75 = arith.constant 0 : index
    %c15 = arith.constant 15 : index
    %c0_76 = arith.constant 0 : index
    %134 = vector.load %arg6[%c0_74, %c0_75, %c15, %c0_76] : memref<1x4x32x32xf32, #tpu.memory_space<vmem>>, vector<1x4x1x32xf32>
    %135 = vector.shape_cast %134 : vector<1x4x1x32xf32> to vector<4x32xf32>
    %136 = vector.shape_cast %133 : vector<4x32xf32> to vector<1x4x1x32xf32>
    tpu.vector_store %arg6[%c0_74, %c0_75, %c15, %c0_76], %136 {strides = array<i32>} : memref<1x4x32x32xf32, #tpu.memory_space<vmem>>, vector<1x4x1x32xf32>,
    %137 = vector.extract_strided_slice %3 {offsets = [0, 128], sizes = [16, 16], strides = [1, 1]} : vector<16x256xf32> to vector<16x16xf32>
    %138 = vector.extract_strided_slice %137 {offsets = [0, 0], sizes = [8, 16], strides = [1, 1]} : vector<16x16xf32> to vector<8x16xf32>
    %cst_77 = arith.constant dense<0.000000e+00> : vector<8x32xf32>
    %139 = tpu.matmul %138, %5, %cst_77 {dimension_numbers = #tpu.dot_dimension_numbers<[1], [0], [0], [1], [0, 0, 1, 1], [], []>} : vector<8x16xf32>, vector<16x32xf32>, vector<8x32xf32> -> vector<8x32xf32>
    %140 = vector.extract_strided_slice %137 {offsets = [8, 0], sizes = [8, 16], strides = [1, 1]} : vector<16x16xf32> to vector<8x16xf32>
    %cst_78 = arith.constant dense<0.000000e+00> : vector<8x32xf32>
    %141 = tpu.matmul %140, %7, %cst_78 {dimension_numbers = #tpu.dot_dimension_numbers<[1], [0], [0], [1], [0, 0, 1, 1], [], []>} : vector<8x16xf32>, vector<16x32xf32>, vector<8x32xf32> -> vector<8x32xf32>
    %142 = arith.addf %139, %141 : vector<8x32xf32>
    %143 = vector.broadcast %8 : vector<8x1xf32> to vector<8x32xf32>
    %144 = arith.addf %142, %143 : vector<8x32xf32>
    %145 = vector.extract_strided_slice %144 {offsets = [0, 0], sizes = [4, 32], strides = [1, 1]} : vector<8x32xf32> to vector<4x32xf32>
    %c0_79 = arith.constant 0 : index
    %c0_80 = arith.constant 0 : index
    %c16 = arith.constant 16 : index
    %c0_81 = arith.constant 0 : index
    %146 = vector.load %arg6[%c0_79, %c0_80, %c16, %c0_81] : memref<1x4x32x32xf32, #tpu.memory_space<vmem>>, vector<1x4x1x32xf32>
    %147 = vector.shape_cast %146 : vector<1x4x1x32xf32> to vector<4x32xf32>
    %148 = vector.shape_cast %145 : vector<4x32xf32> to vector<1x4x1x32xf32>
    tpu.vector_store %arg6[%c0_79, %c0_80, %c16, %c0_81], %148 {strides = array<i32>} : memref<1x4x32x32xf32, #tpu.memory_space<vmem>>, vector<1x4x1x32xf32>,
    %149 = vector.extract_strided_slice %144 {offsets = [4, 0], sizes = [4, 32], strides = [1, 1]} : vector<8x32xf32> to vector<4x32xf32>
    %c0_82 = arith.constant 0 : index
    %c0_83 = arith.constant 0 : index
    %c17 = arith.constant 17 : index
    %c0_84 = arith.constant 0 : index
    %150 = vector.load %arg6[%c0_82, %c0_83, %c17, %c0_84] : memref<1x4x32x32xf32, #tpu.memory_space<vmem>>, vector<1x4x1x32xf32>
    %151 = vector.shape_cast %150 : vector<1x4x1x32xf32> to vector<4x32xf32>
    %152 = vector.shape_cast %149 : vector<4x32xf32> to vector<1x4x1x32xf32>
    tpu.vector_store %arg6[%c0_82, %c0_83, %c17, %c0_84], %152 {strides = array<i32>} : memref<1x4x32x32xf32, #tpu.memory_space<vmem>>, vector<1x4x1x32xf32>,
    %153 = vector.extract_strided_slice %3 {offsets = [0, 144], sizes = [16, 16], strides = [1, 1]} : vector<16x256xf32> to vector<16x16xf32>
    %154 = vector.extract_strided_slice %153 {offsets = [0, 0], sizes = [8, 16], strides = [1, 1]} : vector<16x16xf32> to vector<8x16xf32>
    %cst_85 = arith.constant dense<0.000000e+00> : vector<8x32xf32>
    %155 = tpu.matmul %154, %5, %cst_85 {dimension_numbers = #tpu.dot_dimension_numbers<[1], [0], [0], [1], [0, 0, 1, 1], [], []>} : vector<8x16xf32>, vector<16x32xf32>, vector<8x32xf32> -> vector<8x32xf32>
    %156 = vector.extract_strided_slice %153 {offsets = [8, 0], sizes = [8, 16], strides = [1, 1]} : vector<16x16xf32> to vector<8x16xf32>
    %cst_86 = arith.constant dense<0.000000e+00> : vector<8x32xf32>
    %157 = tpu.matmul %156, %7, %cst_86 {dimension_numbers = #tpu.dot_dimension_numbers<[1], [0], [0], [1], [0, 0, 1, 1], [], []>} : vector<8x16xf32>, vector<16x32xf32>, vector<8x32xf32> -> vector<8x32xf32>
    %158 = arith.addf %155, %157 : vector<8x32xf32>
    %159 = vector.broadcast %8 : vector<8x1xf32> to vector<8x32xf32>
    %160 = arith.addf %158, %159 : vector<8x32xf32>
    %161 = vector.extract_strided_slice %160 {offsets = [0, 0], sizes = [4, 32], strides = [1, 1]} : vector<8x32xf32> to vector<4x32xf32>
    %c0_87 = arith.constant 0 : index
    %c0_88 = arith.constant 0 : index
    %c18 = arith.constant 18 : index
    %c0_89 = arith.constant 0 : index
    %162 = vector.load %arg6[%c0_87, %c0_88, %c18, %c0_89] : memref<1x4x32x32xf32, #tpu.memory_space<vmem>>, vector<1x4x1x32xf32>
    %163 = vector.shape_cast %162 : vector<1x4x1x32xf32> to vector<4x32xf32>
    %164 = vector.shape_cast %161 : vector<4x32xf32> to vector<1x4x1x32xf32>
    tpu.vector_store %arg6[%c0_87, %c0_88, %c18, %c0_89], %164 {strides = array<i32>} : memref<1x4x32x32xf32, #tpu.memory_space<vmem>>, vector<1x4x1x32xf32>,
    %165 = vector.extract_strided_slice %160 {offsets = [4, 0], sizes = [4, 32], strides = [1, 1]} : vector<8x32xf32> to vector<4x32xf32>
    %c0_90 = arith.constant 0 : index
    %c0_91 = arith.constant 0 : index
    %c19 = arith.constant 19 : index
    %c0_92 = arith.constant 0 : index
    %166 = vector.load %arg6[%c0_90, %c0_91, %c19, %c0_92] : memref<1x4x32x32xf32, #tpu.memory_space<vmem>>, vector<1x4x1x32xf32>
    %167 = vector.shape_cast %166 : vector<1x4x1x32xf32> to vector<4x32xf32>
    %168 = vector.shape_cast %165 : vector<4x32xf32> to vector<1x4x1x32xf32>
    tpu.vector_store %arg6[%c0_90, %c0_91, %c19, %c0_92], %168 {strides = array<i32>} : memref<1x4x32x32xf32, #tpu.memory_space<vmem>>, vector<1x4x1x32xf32>,
    %169 = vector.extract_strided_slice %3 {offsets = [0, 160], sizes = [16, 16], strides = [1, 1]} : vector<16x256xf32> to vector<16x16xf32>
    %170 = vector.extract_strided_slice %169 {offsets = [0, 0], sizes = [8, 16], strides = [1, 1]} : vector<16x16xf32> to vector<8x16xf32>
    %cst_93 = arith.constant dense<0.000000e+00> : vector<8x32xf32>
    %171 = tpu.matmul %170, %5, %cst_93 {dimension_numbers = #tpu.dot_dimension_numbers<[1], [0], [0], [1], [0, 0, 1, 1], [], []>} : vector<8x16xf32>, vector<16x32xf32>, vector<8x32xf32> -> vector<8x32xf32>
    %172 = vector.extract_strided_slice %169 {offsets = [8, 0], sizes = [8, 16], strides = [1, 1]} : vector<16x16xf32> to vector<8x16xf32>
    %cst_94 = arith.constant dense<0.000000e+00> : vector<8x32xf32>
    %173 = tpu.matmul %172, %7, %cst_94 {dimension_numbers = #tpu.dot_dimension_numbers<[1], [0], [0], [1], [0, 0, 1, 1], [], []>} : vector<8x16xf32>, vector<16x32xf32>, vector<8x32xf32> -> vector<8x32xf32>
    %174 = arith.addf %171, %173 : vector<8x32xf32>
    %175 = vector.broadcast %8 : vector<8x1xf32> to vector<8x32xf32>
    %176 = arith.addf %174, %175 : vector<8x32xf32>
    %177 = vector.extract_strided_slice %176 {offsets = [0, 0], sizes = [4, 32], strides = [1, 1]} : vector<8x32xf32> to vector<4x32xf32>
    %c0_95 = arith.constant 0 : index
    %c0_96 = arith.constant 0 : index
    %c20 = arith.constant 20 : index
    %c0_97 = arith.constant 0 : index
    %178 = vector.load %arg6[%c0_95, %c0_96, %c20, %c0_97] : memref<1x4x32x32xf32, #tpu.memory_space<vmem>>, vector<1x4x1x32xf32>
    %179 = vector.shape_cast %178 : vector<1x4x1x32xf32> to vector<4x32xf32>
    %180 = vector.shape_cast %177 : vector<4x32xf32> to vector<1x4x1x32xf32>
    tpu.vector_store %arg6[%c0_95, %c0_96, %c20, %c0_97], %180 {strides = array<i32>} : memref<1x4x32x32xf32, #tpu.memory_space<vmem>>, vector<1x4x1x32xf32>,
    %181 = vector.extract_strided_slice %176 {offsets = [4, 0], sizes = [4, 32], strides = [1, 1]} : vector<8x32xf32> to vector<4x32xf32>
    %c0_98 = arith.constant 0 : index
    %c0_99 = arith.constant 0 : index
    %c21 = arith.constant 21 : index
    %c0_100 = arith.constant 0 : index
    %182 = vector.load %arg6[%c0_98, %c0_99, %c21, %c0_100] : memref<1x4x32x32xf32, #tpu.memory_space<vmem>>, vector<1x4x1x32xf32>
    %183 = vector.shape_cast %182 : vector<1x4x1x32xf32> to vector<4x32xf32>
    %184 = vector.shape_cast %181 : vector<4x32xf32> to vector<1x4x1x32xf32>
    tpu.vector_store %arg6[%c0_98, %c0_99, %c21, %c0_100], %184 {strides = array<i32>} : memref<1x4x32x32xf32, #tpu.memory_space<vmem>>, vector<1x4x1x32xf32>,
    %185 = vector.extract_strided_slice %3 {offsets = [0, 176], sizes = [16, 16], strides = [1, 1]} : vector<16x256xf32> to vector<16x16xf32>
    %186 = vector.extract_strided_slice %185 {offsets = [0, 0], sizes = [8, 16], strides = [1, 1]} : vector<16x16xf32> to vector<8x16xf32>
    %cst_101 = arith.constant dense<0.000000e+00> : vector<8x32xf32>
    %187 = tpu.matmul %186, %5, %cst_101 {dimension_numbers = #tpu.dot_dimension_numbers<[1], [0], [0], [1], [0, 0, 1, 1], [], []>} : vector<8x16xf32>, vector<16x32xf32>, vector<8x32xf32> -> vector<8x32xf32>
    %188 = vector.extract_strided_slice %185 {offsets = [8, 0], sizes = [8, 16], strides = [1, 1]} : vector<16x16xf32> to vector<8x16xf32>
    %cst_102 = arith.constant dense<0.000000e+00> : vector<8x32xf32>
    %189 = tpu.matmul %188, %7, %cst_102 {dimension_numbers = #tpu.dot_dimension_numbers<[1], [0], [0], [1], [0, 0, 1, 1], [], []>} : vector<8x16xf32>, vector<16x32xf32>, vector<8x32xf32> -> vector<8x32xf32>
    %190 = arith.addf %187, %189 : vector<8x32xf32>
    %191 = vector.broadcast %8 : vector<8x1xf32> to vector<8x32xf32>
    %192 = arith.addf %190, %191 : vector<8x32xf32>
    %193 = vector.extract_strided_slice %192 {offsets = [0, 0], sizes = [4, 32], strides = [1, 1]} : vector<8x32xf32> to vector<4x32xf32>
    %c0_103 = arith.constant 0 : index
    %c0_104 = arith.constant 0 : index
    %c22 = arith.constant 22 : index
    %c0_105 = arith.constant 0 : index
    %194 = vector.load %arg6[%c0_103, %c0_104, %c22, %c0_105] : memref<1x4x32x32xf32, #tpu.memory_space<vmem>>, vector<1x4x1x32xf32>
    %195 = vector.shape_cast %194 : vector<1x4x1x32xf32> to vector<4x32xf32>
    %196 = vector.shape_cast %193 : vector<4x32xf32> to vector<1x4x1x32xf32>
    tpu.vector_store %arg6[%c0_103, %c0_104, %c22, %c0_105], %196 {strides = array<i32>} : memref<1x4x32x32xf32, #tpu.memory_space<vmem>>, vector<1x4x1x32xf32>,
    %197 = vector.extract_strided_slice %192 {offsets = [4, 0], sizes = [4, 32], strides = [1, 1]} : vector<8x32xf32> to vector<4x32xf32>
    %c0_106 = arith.constant 0 : index
    %c0_107 = arith.constant 0 : index
    %c23 = arith.constant 23 : index
    %c0_108 = arith.constant 0 : index
    %198 = vector.load %arg6[%c0_106, %c0_107, %c23, %c0_108] : memref<1x4x32x32xf32, #tpu.memory_space<vmem>>, vector<1x4x1x32xf32>
    %199 = vector.shape_cast %198 : vector<1x4x1x32xf32> to vector<4x32xf32>
    %200 = vector.shape_cast %197 : vector<4x32xf32> to vector<1x4x1x32xf32>
    tpu.vector_store %arg6[%c0_106, %c0_107, %c23, %c0_108], %200 {strides = array<i32>} : memref<1x4x32x32xf32, #tpu.memory_space<vmem>>, vector<1x4x1x32xf32>,
    %201 = vector.extract_strided_slice %3 {offsets = [0, 192], sizes = [16, 16], strides = [1, 1]} : vector<16x256xf32> to vector<16x16xf32>
    %202 = vector.extract_strided_slice %201 {offsets = [0, 0], sizes = [8, 16], strides = [1, 1]} : vector<16x16xf32> to vector<8x16xf32>
    %cst_109 = arith.constant dense<0.000000e+00> : vector<8x32xf32>
    %203 = tpu.matmul %202, %5, %cst_109 {dimension_numbers = #tpu.dot_dimension_numbers<[1], [0], [0], [1], [0, 0, 1, 1], [], []>} : vector<8x16xf32>, vector<16x32xf32>, vector<8x32xf32> -> vector<8x32xf32>
    %204 = vector.extract_strided_slice %201 {offsets = [8, 0], sizes = [8, 16], strides = [1, 1]} : vector<16x16xf32> to vector<8x16xf32>
    %cst_110 = arith.constant dense<0.000000e+00> : vector<8x32xf32>
    %205 = tpu.matmul %204, %7, %cst_110 {dimension_numbers = #tpu.dot_dimension_numbers<[1], [0], [0], [1], [0, 0, 1, 1], [], []>} : vector<8x16xf32>, vector<16x32xf32>, vector<8x32xf32> -> vector<8x32xf32>
    %206 = arith.addf %203, %205 : vector<8x32xf32>
    %207 = vector.broadcast %8 : vector<8x1xf32> to vector<8x32xf32>
    %208 = arith.addf %206, %207 : vector<8x32xf32>
    %209 = vector.extract_strided_slice %208 {offsets = [0, 0], sizes = [4, 32], strides = [1, 1]} : vector<8x32xf32> to vector<4x32xf32>
    %c0_111 = arith.constant 0 : index
    %c0_112 = arith.constant 0 : index
    %c24 = arith.constant 24 : index
    %c0_113 = arith.constant 0 : index
    %210 = vector.load %arg6[%c0_111, %c0_112, %c24, %c0_113] : memref<1x4x32x32xf32, #tpu.memory_space<vmem>>, vector<1x4x1x32xf32>
    %211 = vector.shape_cast %210 : vector<1x4x1x32xf32> to vector<4x32xf32>
    %212 = vector.shape_cast %209 : vector<4x32xf32> to vector<1x4x1x32xf32>
    tpu.vector_store %arg6[%c0_111, %c0_112, %c24, %c0_113], %212 {strides = array<i32>} : memref<1x4x32x32xf32, #tpu.memory_space<vmem>>, vector<1x4x1x32xf32>,
    %213 = vector.extract_strided_slice %208 {offsets = [4, 0], sizes = [4, 32], strides = [1, 1]} : vector<8x32xf32> to vector<4x32xf32>
    %c0_114 = arith.constant 0 : index
    %c0_115 = arith.constant 0 : index
    %c25 = arith.constant 25 : index
    %c0_116 = arith.constant 0 : index
    %214 = vector.load %arg6[%c0_114, %c0_115, %c25, %c0_116] : memref<1x4x32x32xf32, #tpu.memory_space<vmem>>, vector<1x4x1x32xf32>
    %215 = vector.shape_cast %214 : vector<1x4x1x32xf32> to vector<4x32xf32>
    %216 = vector.shape_cast %213 : vector<4x32xf32> to vector<1x4x1x32xf32>
    tpu.vector_store %arg6[%c0_114, %c0_115, %c25, %c0_116], %216 {strides = array<i32>} : memref<1x4x32x32xf32, #tpu.memory_space<vmem>>, vector<1x4x1x32xf32>,
    %217 = vector.extract_strided_slice %3 {offsets = [0, 208], sizes = [16, 16], strides = [1, 1]} : vector<16x256xf32> to vector<16x16xf32>
    %218 = vector.extract_strided_slice %217 {offsets = [0, 0], sizes = [8, 16], strides = [1, 1]} : vector<16x16xf32> to vector<8x16xf32>
    %cst_117 = arith.constant dense<0.000000e+00> : vector<8x32xf32>
    %219 = tpu.matmul %218, %5, %cst_117 {dimension_numbers = #tpu.dot_dimension_numbers<[1], [0], [0], [1], [0, 0, 1, 1], [], []>} : vector<8x16xf32>, vector<16x32xf32>, vector<8x32xf32> -> vector<8x32xf32>
    %220 = vector.extract_strided_slice %217 {offsets = [8, 0], sizes = [8, 16], strides = [1, 1]} : vector<16x16xf32> to vector<8x16xf32>
    %cst_118 = arith.constant dense<0.000000e+00> : vector<8x32xf32>
    %221 = tpu.matmul %220, %7, %cst_118 {dimension_numbers = #tpu.dot_dimension_numbers<[1], [0], [0], [1], [0, 0, 1, 1], [], []>} : vector<8x16xf32>, vector<16x32xf32>, vector<8x32xf32> -> vector<8x32xf32>
    %222 = arith.addf %219, %221 : vector<8x32xf32>
    %223 = vector.broadcast %8 : vector<8x1xf32> to vector<8x32xf32>
    %224 = arith.addf %222, %223 : vector<8x32xf32>
    %225 = vector.extract_strided_slice %224 {offsets = [0, 0], sizes = [4, 32], strides = [1, 1]} : vector<8x32xf32> to vector<4x32xf32>
    %c0_119 = arith.constant 0 : index
    %c0_120 = arith.constant 0 : index
    %c26 = arith.constant 26 : index
    %c0_121 = arith.constant 0 : index
    %226 = vector.load %arg6[%c0_119, %c0_120, %c26, %c0_121] : memref<1x4x32x32xf32, #tpu.memory_space<vmem>>, vector<1x4x1x32xf32>
    %227 = vector.shape_cast %226 : vector<1x4x1x32xf32> to vector<4x32xf32>
    %228 = vector.shape_cast %225 : vector<4x32xf32> to vector<1x4x1x32xf32>
    tpu.vector_store %arg6[%c0_119, %c0_120, %c26, %c0_121], %228 {strides = array<i32>} : memref<1x4x32x32xf32, #tpu.memory_space<vmem>>, vector<1x4x1x32xf32>,
    %229 = vector.extract_strided_slice %224 {offsets = [4, 0], sizes = [4, 32], strides = [1, 1]} : vector<8x32xf32> to vector<4x32xf32>
    %c0_122 = arith.constant 0 : index
    %c0_123 = arith.constant 0 : index
    %c27 = arith.constant 27 : index
    %c0_124 = arith.constant 0 : index
    %230 = vector.load %arg6[%c0_122, %c0_123, %c27, %c0_124] : memref<1x4x32x32xf32, #tpu.memory_space<vmem>>, vector<1x4x1x32xf32>
    %231 = vector.shape_cast %230 : vector<1x4x1x32xf32> to vector<4x32xf32>
    %232 = vector.shape_cast %229 : vector<4x32xf32> to vector<1x4x1x32xf32>
    tpu.vector_store %arg6[%c0_122, %c0_123, %c27, %c0_124], %232 {strides = array<i32>} : memref<1x4x32x32xf32, #tpu.memory_space<vmem>>, vector<1x4x1x32xf32>,
    %233 = vector.extract_strided_slice %3 {offsets = [0, 224], sizes = [16, 16], strides = [1, 1]} : vector<16x256xf32> to vector<16x16xf32>
    %234 = vector.extract_strided_slice %233 {offsets = [0, 0], sizes = [8, 16], strides = [1, 1]} : vector<16x16xf32> to vector<8x16xf32>
    %cst_125 = arith.constant dense<0.000000e+00> : vector<8x32xf32>
    %235 = tpu.matmul %234, %5, %cst_125 {dimension_numbers = #tpu.dot_dimension_numbers<[1], [0], [0], [1], [0, 0, 1, 1], [], []>} : vector<8x16xf32>, vector<16x32xf32>, vector<8x32xf32> -> vector<8x32xf32>
    %236 = vector.extract_strided_slice %233 {offsets = [8, 0], sizes = [8, 16], strides = [1, 1]} : vector<16x16xf32> to vector<8x16xf32>
    %cst_126 = arith.constant dense<0.000000e+00> : vector<8x32xf32>
    %237 = tpu.matmul %236, %7, %cst_126 {dimension_numbers = #tpu.dot_dimension_numbers<[1], [0], [0], [1], [0, 0, 1, 1], [], []>} : vector<8x16xf32>, vector<16x32xf32>, vector<8x32xf32> -> vector<8x32xf32>
    %238 = arith.addf %235, %237 : vector<8x32xf32>
    %239 = vector.broadcast %8 : vector<8x1xf32> to vector<8x32xf32>
    %240 = arith.addf %238, %239 : vector<8x32xf32>
    %241 = vector.extract_strided_slice %240 {offsets = [0, 0], sizes = [4, 32], strides = [1, 1]} : vector<8x32xf32> to vector<4x32xf32>
    %c0_127 = arith.constant 0 : index
    %c0_128 = arith.constant 0 : index
    %c28 = arith.constant 28 : index
    %c0_129 = arith.constant 0 : index
    %242 = vector.load %arg6[%c0_127, %c0_128, %c28, %c0_129] : memref<1x4x32x32xf32, #tpu.memory_space<vmem>>, vector<1x4x1x32xf32>
    %243 = vector.shape_cast %242 : vector<1x4x1x32xf32> to vector<4x32xf32>
    %244 = vector.shape_cast %241 : vector<4x32xf32> to vector<1x4x1x32xf32>
    tpu.vector_store %arg6[%c0_127, %c0_128, %c28, %c0_129], %244 {strides = array<i32>} : memref<1x4x32x32xf32, #tpu.memory_space<vmem>>, vector<1x4x1x32xf32>,
    %245 = vector.extract_strided_slice %240 {offsets = [4, 0], sizes = [4, 32], strides = [1, 1]} : vector<8x32xf32> to vector<4x32xf32>
    %c0_130 = arith.constant 0 : index
    %c0_131 = arith.constant 0 : index
    %c29 = arith.constant 29 : index
    %c0_132 = arith.constant 0 : index
    %246 = vector.load %arg6[%c0_130, %c0_131, %c29, %c0_132] : memref<1x4x32x32xf32, #tpu.memory_space<vmem>>, vector<1x4x1x32xf32>
    %247 = vector.shape_cast %246 : vector<1x4x1x32xf32> to vector<4x32xf32>
    %248 = vector.shape_cast %245 : vector<4x32xf32> to vector<1x4x1x32xf32>
    tpu.vector_store %arg6[%c0_130, %c0_131, %c29, %c0_132], %248 {strides = array<i32>} : memref<1x4x32x32xf32, #tpu.memory_space<vmem>>, vector<1x4x1x32xf32>,
    %249 = vector.extract_strided_slice %3 {offsets = [0, 240], sizes = [16, 16], strides = [1, 1]} : vector<16x256xf32> to vector<16x16xf32>
    %250 = vector.extract_strided_slice %249 {offsets = [0, 0], sizes = [8, 16], strides = [1, 1]} : vector<16x16xf32> to vector<8x16xf32>
    %cst_133 = arith.constant dense<0.000000e+00> : vector<8x32xf32>
    %251 = tpu.matmul %250, %5, %cst_133 {dimension_numbers = #tpu.dot_dimension_numbers<[1], [0], [0], [1], [0, 0, 1, 1], [], []>} : vector<8x16xf32>, vector<16x32xf32>, vector<8x32xf32> -> vector<8x32xf32>
    %252 = vector.extract_strided_slice %249 {offsets = [8, 0], sizes = [8, 16], strides = [1, 1]} : vector<16x16xf32> to vector<8x16xf32>
    %cst_134 = arith.constant dense<0.000000e+00> : vector<8x32xf32>
    %253 = tpu.matmul %252, %7, %cst_134 {dimension_numbers = #tpu.dot_dimension_numbers<[1], [0], [0], [1], [0, 0, 1, 1], [], []>} : vector<8x16xf32>, vector<16x32xf32>, vector<8x32xf32> -> vector<8x32xf32>
    %254 = arith.addf %251, %253 : vector<8x32xf32>
    %255 = vector.broadcast %8 : vector<8x1xf32> to vector<8x32xf32>
    %256 = arith.addf %254, %255 : vector<8x32xf32>
    %257 = vector.extract_strided_slice %256 {offsets = [0, 0], sizes = [4, 32], strides = [1, 1]} : vector<8x32xf32> to vector<4x32xf32>
    %c0_135 = arith.constant 0 : index
    %c0_136 = arith.constant 0 : index
    %c30 = arith.constant 30 : index
    %c0_137 = arith.constant 0 : index
    %258 = vector.load %arg6[%c0_135, %c0_136, %c30, %c0_137] : memref<1x4x32x32xf32, #tpu.memory_space<vmem>>, vector<1x4x1x32xf32>
    %259 = vector.shape_cast %258 : vector<1x4x1x32xf32> to vector<4x32xf32>
    %260 = vector.shape_cast %257 : vector<4x32xf32> to vector<1x4x1x32xf32>
    tpu.vector_store %arg6[%c0_135, %c0_136, %c30, %c0_137], %260 {strides = array<i32>} : memref<1x4x32x32xf32, #tpu.memory_space<vmem>>, vector<1x4x1x32xf32>,
    %261 = vector.extract_strided_slice %256 {offsets = [4, 0], sizes = [4, 32], strides = [1, 1]} : vector<8x32xf32> to vector<4x32xf32>
    %c0_138 = arith.constant 0 : index
    %c0_139 = arith.constant 0 : index
    %c31 = arith.constant 31 : index
    %c0_140 = arith.constant 0 : index
    %262 = vector.load %arg6[%c0_138, %c0_139, %c31, %c0_140] : memref<1x4x32x32xf32, #tpu.memory_space<vmem>>, vector<1x4x1x32xf32>
    %263 = vector.shape_cast %262 : vector<1x4x1x32xf32> to vector<4x32xf32>
    %264 = vector.shape_cast %261 : vector<4x32xf32> to vector<1x4x1x32xf32>
    tpu.vector_store %arg6[%c0_138, %c0_139, %c31, %c0_140], %264 {strides = array<i32>} : memref<1x4x32x32xf32, #tpu.memory_space<vmem>>, vector<1x4x1x32xf32>,
    return
  }
  func.func @transform_0(%arg0: i32, %arg1: i32) -> (i32, i32) {
    %c0_i32 = arith.constant 0 : i32
    %c0_i32_0 = arith.constant 0 : i32
    %c0_i32_1 = arith.constant 0 : i32
    return %c0_i32, %c0_i32_0 : i32, i32
  }
  func.func @transform_1(%arg0: i32, %arg1: i32) -> (i32, i32) {
    %c0_i32 = arith.constant 0 : i32
    %c0_i32_0 = arith.constant 0 : i32
    %c0_i32_1 = arith.constant 0 : i32
    return %c0_i32, %c0_i32_0 : i32, i32
  }
  func.func @transform_2(%arg0: i32, %arg1: i32) -> (i32, i32, i32) {
    %c0_i32 = arith.constant 0 : i32
    %c0_i32_0 = arith.constant 0 : i32
    %c0_i32_1 = arith.constant 0 : i32
    %c0_i32_2 = arith.constant 0 : i32
    return %c0_i32, %c0_i32_0, %c0_i32_1 : i32, i32, i32
  }
  func.func @transform_3(%arg0: i32, %arg1: i32) -> (i32, i32, i32) {
    %c0_i32 = arith.constant 0 : i32
    %c0_i32_0 = arith.constant 0 : i32
    return %arg0, %c0_i32, %arg1 : i32, i32, i32
  }
  func.func @transform_4(%arg0: i32, %arg1: i32) -> (i32, i32, i32, i32) {
    %c0_i32 = arith.constant 0 : i32
    %c0_i32_0 = arith.constant 0 : i32
    %c0_i32_1 = arith.constant 0 : i32
    return %arg0, %c0_i32, %arg1, %c0_i32_0 : i32, i32, i32, i32
  }
}

</mosaic_0001>

<bundles_post_ra>
// kernel: tpu_custom_call.1
= control target key start
LH: loop header
LB: loop body
LE: loop exit
PB: predicated region body
PF: predicated region fallthrough
CT: control target
= control target key end

     0   :  { %9 = vsyncpa [#allocation3], 0  ;;  %s5345_s0 = inlined_call_operand.vmem [shape: f32[16,4], index: 0, kind: input, shape index: {}]   ;;  %s5346_s1 = inlined_call_operand.vmem [shape: f32[8,1], index: 1, kind: input, shape index: {}]   ;;  %s5347_s2 = inlined_call_operand.vmem [shape: f32[2,16,32], index: 2, kind: input, shape index: {}]   ;;  %s5348_s3 = inlined_call_operand.hbm [shape: f32[2,4,256], index: 3, kind: input, shape index: {}]   ;;  %s5349_s4 = inlined_call_operand.hbm [shape: f32[2,4,32,32], index: 4, kind: output, shape index: {}]  }
   0x1   :  { %11 = vsyncpa [#allocation3 + $0x1], 0 }
   0x2   :  { %12 = vsyncpa [#allocation4], 0 }
   0x3   :  { %14 = vsyncpa [#allocation4 + $0x1], 0  ;;  %s4584_s15 = smov 0   ;;  %s4586_s16 = smov 0  }
   0x4   :  { %s4588_s17 = smov 0   ;;  %s4590_s18 = smov 0  }
   0x5   :  { %s4592_s19 = smov 0   ;;  %s4594_s20 = smov 0  }
   0x6 LB: > { %s3880_s21 = sadd.s32 4294967295, %s4541_s20   ;;  %s3881_s22 = sadd.s32 4294967294, %s4541_s20   ;;  %s4541_s20 = sphi %s4594_s20, %s20_s20   ;;  %s4537_s19 = sphi %s4592_s19, %s5365_s19   ;;  %s4533_s18 = sphi %s4590_s18, %s5364_s18   ;;  %s4529_s17 = sphi %s4588_s17, %s5363_s17   ;;  %s4525_s16 = sphi %s4586_s16, %s5362_s16   ;;  %s4521_s15 = sphi %s4584_s15, %s5361_s15  }
   0x7   : > { %s32_s23 = sadd.s32 1, %s4537_s19  ;;  %s104_s24 = sadd.s32 1, %s4529_s17 }
   0x8   : > { %p34_p0 = scmp.ge.s32.totalorder %s32_s23, 2  ;;  %p111_p1 = scmp.ne.s32.totalorder %s4529_s17, %s4525_s16 }
   0x9   : > { %p112_p2 = scmp.eq.s32.totalorder %s4541_s20, 0  ;;  %p117_p3 = scmp.ne.s32.totalorder %s4525_s16, %s4521_s15 }
   0xa   : > { %s5367_s23 = smov (%p34_p0, %s32_s23), 0  ;;  %p118_p5 = scmp.eq.s32.totalorder %s3880_s21, 0 }
   0xb   : > { %p4625_p4 = por %p112_p2, %p111_p1  ;;  %s99_s26 = ssub.s32 %s4537_s19, %s5367_s23 }
   0xc   : > { %p143_p6 = scmp.eq.s32.totalorder %s3880_s21, 1  ;;  %p102_p7 = scmp.eq.s32.totalorder %s99_s26, 0 }
   0xd   : > { %p4631_p8 = por %p118_p5, %p117_p3  ;;  %p149_p10 = scmp.eq.s32.totalorder %s3881_s22, 1 }
   0xe   : > { %p4635_p9 = por %p143_p6, %p111_p1  ;;  %p4363_p13 = scmp.lt.s32.totalorder %s4541_s20, 2 }
   0xf   : > { %s4640_s29 = scalar_select %p102_p7, %s4529_s17, %s104_s24  }
  0x10   : > { %s5353_s28 = scalar_select %p4635_p9, 1, 0 }
  0x11   : > { %p4642_p11 = por %p149_p10, %p117_p3  ;;  %s178_s5 = sand.u32 1, %s4529_s17  }
  0x12   : > { %s3884_s6 = sshll.u32 %s178_s5, 3  ;;  %s3933_s7 = sshll.u32 %s4537_s19, 7 }
  0x13   : > { %s5354_s30 = scalar_select %p4642_p11, 1, 0 }
  0x14   : > { %s4653_s10 = scalar_lea.hbm %s5348_s3, %s3933_s7  ;;  %s182_s11 = scalar_lea.vmem [#allocation2], %s3884_s6 }
  0x15   : > { %s192_s12 = sshll.u32 %s182_s11, 4  ;;  %p4659_p0 = pnand %p4363_p13, %p4625_p4  ;;  %s4655_s12 = int_to_ptr.vmem [resolvable:$true] %s192_s12 }
  0x16   : > { %s179_s14 = scalar_lea.sflag [#allocation3], %s178_s5  ;;  %s4429_s21 = scalar_lea.hbm %s4653_s10, 128 }
  0x17   : > { %p4430_p3 = scmp.ne.s32.totalorder %s4653_s10, %s4429_s21  ;;  %p4431_p5 = pneg %p4659_p0 }
  0x18   : > { %s4434_s25 = scalar_lea.hbm %s5348_s3, 256  ;;  %p4435_p4 = scmp.lt.u32.totalorder %s4653_s10, %s5348_s3 }
  0x19   : > { %p4432_p6 = pnand %p4431_p5, %p4430_p3  ;;  %p4436_p10 = scmp.lt.u32.totalorder %s4434_s25, %s4429_s21 }
  0x1a   : > { %p4438_p12 = scmp.lt.u32.totalorder %s4429_s21, %s4653_s10 }
  0x1b   : > { %p4433_p7 = pneg %p4432_p6  ;;  %p4437_p13 = por %p4436_p10, %p4435_p4 }
  0x1d   : > { %p4439_p1 = por %p4438_p12, %p4437_p13 }
  0x1f   : > { %p4440_p2 = pnand %p4439_p1, %p4433_p7 }
  0x21   : > { %4443 = shalt.err (!%p4440_p2)
}
  0x22   : > { %s4444_s5 = scalar_lea.vmem %s4655_s12, 128  ;;  %s4543_s7 = smov [#allocation2]  }
  0x23   : > { %p4445_p3 = scmp.ne.s32.totalorder %s4655_s12, %s4444_s5  ;;  %s4449_s8 = sshll.u32 %s4543_s7, 4  ;;  %s4450_s8 = int_to_ptr.vmem [resolvable:$false] %s4449_s8 }
  0x24   : > { %s4451_s9 = scalar_lea.vmem %s4450_s8, 256  ;;  %p4452_p9 = scmp.lt.s32.totalorder %s4655_s12, %s4450_s8 }
  0x25   : > { %p4447_p6 = pnand %p4445_p3, %p4431_p5  ;;  %p4453_p4 = scmp.lt.s32.totalorder %s4451_s9, %s4444_s5 }
  0x27   : > { %p4448_p11 = pneg %p4447_p6  ;;  %p4454_p10 = por %p4453_p4, %p4452_p9 }
  0x29   : > { %p4455_p12 = pnand %p4454_p10, %p4448_p11 }
  0x2b   : > { %4458 = shalt.err (!%p4455_p12)
}
  0x2c   : > { %4358 = dma.hbm_to_vmem [thread:$0]  (!%p4659_p0), %s4653_s10, 128, %s4655_s12, %s179_s14  }
  0x2d   : > { %p5356_p1 = scmp.lt.s32.totalorder %s4541_s20, 3  ;;  %p5357_p2 = scmp.ge.s32.totalorder %s4541_s20, 1 }
  0x2f   : > { %p198_p5 = pnand %p5357_p2, %p5356_p1 }
  0x30   : > { %s4695_s11 = sand.u32 (!%p198_p5), 1, %s4525_s16  }
  0x31   : > { %201 = sbr.rel (%p198_p5) target bundleno = 703 (0x2bf), region = 36  ;;  %s3888_s21 = sshll.u32 (!%p198_p5), %s4695_s11, 3 }
  0x32   : > { %s204_s22 = scalar_lea.sflag (!%p198_p5), [#allocation3], %s4695_s11  ;;  %s207_s24 = scalar_lea.vmem (!%p198_p5), [#allocation2], %s3888_s21 }
  0x38   : > { %4512 = dma.done.wait (%p4631_p8), %s204_s22, 128  }
  0x39   : > { %4514 = vsyncadd (%p4631_p8), %s204_s22, 4294967168  ;;  %v4544_v0 = vmov 0.0   ;;  %v234_v1 = vld [vmem:[%s207_s24] sm:$0xff]  ;;  %vm246_vm0 = vcmask 1043456   ;;  %vm239_vm1 = vcmask 31744   ;;  %v3894_v5 = vld [vmem:[%s5347_s2 + $0x10] sm:$0xff]  ;;  %v491_v48 = vlaneseq }
  0x3a   : > { %315 = vmatprep.mubr.f32.mxu0 %v4544_v0  ;;  %v238_v2 = vcombine.high %v234_v1, %v234_v1  ;;  %v235_v3 = vld [vmem:[%s5345_s0] sm:$0xff]  ;;  %v236_v4 = vld [vmem:[%s5345_s0 + $0x8] sm:$0xff]  ;;  %v3895_v6 = vld [vmem:[%s5347_s2 + $0x18] sm:$0xff]  ;;  %v4545_v8 = vmov 0.0|0.0   ;;  %vm4546_vm2 = vmmov 0   ;;  %v4547_v9 = vmov 0  }
  0x3b   : > { %v4717_v7 = vpack.c.bf16 %v3895_v6, %v3894_v5  ;;  %4255 = vmatprep.subr.bf16.mxu1 %v4545_v8  ;;  %4035 = vmatprep.mubr.msk.f32.mxu1 %vm4546_vm2, %v4544_v0  ;;  %v328_v11 = vld [vmem:[%s5347_s2] sm:$0xff]  ;;  %v329_v12 = vld [vmem:[%s5347_s2 + $0x8] sm:$0xff]  ;;  %s4548_s21 = smov 96   ;;  %vm334_vm3 = vcmask 130048   ;;  %s4549_s22 = smov 112   ;;  %v492_v52 = vshrl.u32 %v491_v48, 7 }
  0x3c   : > { %3890 = vmatprep.subr.msk.mxu0 %vm246_vm0, %v238_v2  ;;  %4427 = vset.pattern.permute.xlu0 %v4547_v9  ;;  %v4738_v14 = vpack.c.bf16 %v329_v12, %v328_v11  ;;  %s4550_s24 = smov 80   ;;  %s4551_s10 = smov 64   ;;  %v333_v17 = vld [vmem:[%s5346_s1] sm:$0xff]  ;;  %v4555_v46 = vmov 1966171168   ;;  %vm516_vm4 = vcmask 253952  }
  0x3d   : > { %3891 = vmatpush1.msk.msra.mxu0 %vm246_vm0, %v234_v1  ;;  %4257 = vmatpush3.bf16.msra.mxu1 %v4717_v7  ;;  %s4552_s12 = smov 48   ;;  %s4553_s13 = smov 32   ;;  %v489_v47 = vunpack.c.l.s4 %v4555_v46 }
  0x3e   : > { %3892 = vmatmul.mubr.msk.f32.vlgmr.msra.gmra.mrb[0].mxu0 %vm239_vm1, %v235_v3  ;;  %4261 = vmatprep.subr.bf16.mxu0 %v4545_v8  ;;  %s4554_s14 = smov 16   ;;  %s3889_s26 = sshll.u32 %s4695_s11, 7 }
  0x3f   : > { %321 = vmatprep.mubr.f32.mxu0 %v4544_v0  ;;  %4263 = vmatpush3.bf16.msra.mxu0 %v4717_v7  ;;  %v490_v51 = vunpack.c.0.s8 %v489_v47  ;;  %s4924_s6 = scalar_lea.vmem [#allocation5], %s3889_s26  ;;  %s3934_s5 = sshll.u32 %s4533_s18, 11 }
  0x40   : > { %4258 = vmatprep.subr.bf16.mxu1 %v4545_v8  ;;  %4267 = vmatprep.subr.bf16.mxu0 %v4545_v8  ;;  %s3793_s7 = sshll.u32 %s4924_s6, 4  ;;  %s3778_s18 = scalar_lea.sflag [#allocation4], %s4695_s11  ;;  %s5288_s7 = int_to_ptr.vmem [resolvable:$true] %s3793_s7 }
  0x41   : > { %v4916_v57 = vsub.s32 %v490_v51, %v492_v52  ;;  %p5358_p9 = scmp.ne.s32.totalorder %s5353_s28, 0 }
  0x42   : > { %3893 = vmatmul.mubr.msk.f32.gmra.mrb[2].mxu0 %vm239_vm1, %v236_v4 }
  0x43   : > { %4049 = vmatprep.mubr.msk.f32.mxu0 %vm4546_vm2, %v4544_v0 }
 0x111   : > { %v317_v10 = vpop.f32.mrb[0].mxu0 }
 0x112   : > { %843 = vrot.lane.b32.xlu1 %v317_v10, %s4548_s21  ;;  %v4736_v13 = vpop.f32.mrb[1].mxu0 }
 0x115   : > { %v323_v15 = vpop.f32.mrb[2].mxu0 }
 0x116   : > { %769 = vrot.lane.b32.xlu1 %v323_v15, %s4548_s21  ;;  %554 = vrot.lane.b32.xlu0 %v323_v15, %s4549_s22  ;;  %v4741_v16 = vpop.f32.mrb[3].mxu0 }
 0x117   : > { %4036 = vmatmul.mubr.msk.f32.vlgmr.msra.gmra.mrb[0].mxu1 %vm334_vm3, %v323_v15 }
 0x118   : > { %4260 = vmatpush3.bf16.msra.mxu1 %v4738_v14  ;;  %4042 = vmatprep.mubr.msk.f32.mxu1 %vm4546_vm2, %v4544_v0 }
 0x119   : > { %4264 = vmatprep.subr.bf16.mxu1 %v4545_v8 }
 0x11a   : > { %1058 = vrot.lane.b32.xlu1 %v317_v10, %s4550_s24  ;;  %628 = vrot.lane.b32.xlu0 %v317_v10, %s4549_s22 }
 0x11b   : > { %4043 = vmatmul.mubr.msk.f32.vlgmr.msra.gmra.mrb[2].mxu1 %vm334_vm3, %v317_v10 }
 0x11c   : > { %4266 = vmatpush3.bf16.msra.mxu1 %v4738_v14  ;;  %4056 = vmatprep.mubr.msk.f32.mxu1 %vm4546_vm2, %v4544_v0 }
 0x11d   : > { %4270 = vmatprep.subr.bf16.mxu1 %v4545_v8 }
 0x11e   : > { %1273 = vrot.lane.b32.xlu1 %v317_v10, %s4551_s10  ;;  %984 = vrot.lane.b32.xlu0 %v323_v15, %s4550_s24 }
 0x122   : > { %1488 = vrot.lane.b32.xlu1 %v317_v10, %s4552_s12  ;;  %1199 = vrot.lane.b32.xlu0 %v323_v15, %s4551_s10 }
 0x126   : > { %1703 = vrot.lane.b32.xlu1 %v317_v10, %s4553_s13  ;;  %1414 = vrot.lane.b32.xlu0 %v323_v15, %s4552_s12 }
 0x12a   : > { %1918 = vrot.lane.b32.xlu1 %v317_v10, %s4554_s14  ;;  %1629 = vrot.lane.b32.xlu0 %v323_v15, %s4553_s13 }
 0x12e   : > { %2346 = vrot.lane.b32.xlu1 %v4736_v13, %s4549_s22  ;;  %1844 = vrot.lane.b32.xlu0 %v323_v15, %s4554_s14 }
 0x132   : > { %2561 = vrot.lane.b32.xlu1 %v4736_v13, %s4548_s21  ;;  %2272 = vrot.lane.b32.xlu0 %v4741_v16, %s4549_s22  ;;  %s4459_s22 = scalar_lea.vmem %s5288_s7, 2048 }
 0x133   : > { %p4460_p8 = scmp.ne.s32.totalorder %s5288_s7, %s4459_s22 }
 0x135   : > { %p4461_p11 = pnand %p4460_p8, %p5358_p9 }
 0x136   : > { %2776 = vrot.lane.b32.xlu1 %v4736_v13, %s4550_s24  ;;  %2487 = vrot.lane.b32.xlu0 %v4741_v16, %s4548_s21  ;;  %s5286_s21 = scalar_lea.hbm %s5349_s4, %s3934_s5 }
 0x137   : > { %p4462_p0 = pneg %p4461_p11 }
 0x13a   : > { %2991 = vrot.lane.b32.xlu1 %v4736_v13, %s4551_s10  ;;  %2702 = vrot.lane.b32.xlu0 %v4741_v16, %s4550_s24  ;;  %s4556_s24 = smov [#allocation5]  }
 0x13e   : > { %3206 = vrot.lane.b32.xlu1 %v4736_v13, %s4552_s12  ;;  %2917 = vrot.lane.b32.xlu0 %v4741_v16, %s4551_s10  ;;  %s4463_s10 = sshll.u32 %s4556_s24, 4  ;;  %s4464_s10 = int_to_ptr.vmem [resolvable:$false] %s4463_s10 }
 0x13f   : > { %p4466_p7 = scmp.lt.s32.totalorder %s5288_s7, %s4464_s10 }
 0x142   : > { %3421 = vrot.lane.b32.xlu1 %v4736_v13, %s4553_s13  ;;  %3132 = vrot.lane.b32.xlu0 %v4741_v16, %s4552_s12  ;;  %s4465_s12 = scalar_lea.vmem %s4464_s10, 4096 }
 0x143   : > { %p4467_p13 = scmp.lt.s32.totalorder %s4465_s12, %s4459_s22 }
 0x145   : > { %p4468_p3 = por %p4467_p13, %p4466_p7 }
 0x146   : > { %3636 = vrot.lane.b32.xlu1 %v4736_v13, %s4554_s14  ;;  %3347 = vrot.lane.b32.xlu0 %v4741_v16, %s4553_s13 }
 0x147   : > { %p4469_p6 = pnand %p4468_p3, %p4462_p0 }
 0x14a   : > { %3562 = vrot.lane.b32.xlu0 %v4741_v16, %s4554_s14 }
 0x14e   : > { %483 = vperm.xlu0 %4427, %v333_v17  }
 0x184   : > { %v844_v18 = vpop.permute.xlu1 %843 }
 0x188   : > { %v770_v19 = vpop.permute.xlu1 %769  ;;  %v555_v20 = vpop.permute.xlu0 %554 }
 0x189   : > { %4050 = vmatmul.mubr.msk.f32.vlgmr.msra.gmra.mrb[4].mxu0 %vm334_vm3, %v555_v20 }
 0x18a   : > { %4269 = vmatpush3.bf16.msra.mxu0 %v4717_v7  ;;  %4063 = vmatprep.mubr.msk.f32.mxu0 %vm4546_vm2, %v4544_v0 }
 0x18b   : > { %4273 = vmatprep.subr.bf16.mxu0 %v4545_v8 }
 0x18c   : > { %v1059_v21 = vpop.permute.xlu1 %1058  ;;  %v629_v22 = vpop.permute.xlu0 %628 }
 0x18d   : > { %4057 = vmatmul.mubr.msk.f32.vlgmr.msra.gmra.mrb[4].mxu1 %vm334_vm3, %v629_v22  ;;  %4064 = vmatmul.mubr.msk.f32.vlgmr.msra.gmra.mrb[6].mxu0 %vm334_vm3, %v770_v19 }
 0x18e   : > { %4272 = vmatpush3.bf16.msra.mxu1 %v4738_v14  ;;  %4275 = vmatpush3.bf16.msra.mxu0 %v4717_v7 }
 0x18f   : > { %4077 = vmatprep.mubr.msk.f32.mxu0 %vm4546_vm2, %v4544_v0  ;;  %4070 = vmatprep.mubr.msk.f32.mxu1 %vm4546_vm2, %v4544_v0 }
 0x190   : > { %v1274_v23 = vpop.permute.xlu1 %1273  ;;  %v985_v24 = vpop.permute.xlu0 %984  ;;  %4276 = vmatprep.subr.bf16.mxu1 %v4545_v8  ;;  %4279 = vmatprep.subr.bf16.mxu0 %v4545_v8 }
 0x191   : > { %4071 = vmatmul.mubr.msk.f32.vlgmr.msra.gmra.mrb[6].mxu1 %vm334_vm3, %v844_v18  ;;  %4078 = vmatmul.mubr.msk.f32.vlgmr.msra.gmra.mrb[8].mxu0 %vm334_vm3, %v985_v24 }
 0x192   : > { %4278 = vmatpush3.bf16.msra.mxu1 %v4738_v14  ;;  %4281 = vmatpush3.bf16.msra.mxu0 %v4717_v7 }
 0x193   : > { %4091 = vmatprep.mubr.msk.f32.mxu0 %vm4546_vm2, %v4544_v0  ;;  %4084 = vmatprep.mubr.msk.f32.mxu1 %vm4546_vm2, %v4544_v0 }
 0x194   : > { %v1489_v25 = vpop.permute.xlu1 %1488  ;;  %v1200_v26 = vpop.permute.xlu0 %1199  ;;  %4282 = vmatprep.subr.bf16.mxu1 %v4545_v8  ;;  %4285 = vmatprep.subr.bf16.mxu0 %v4545_v8 }
 0x195   : > { %4085 = vmatmul.mubr.msk.f32.vlgmr.msra.gmra.mrb[8].mxu1 %vm334_vm3, %v1059_v21  ;;  %4092 = vmatmul.mubr.msk.f32.vlgmr.msra.gmra.mrb[10].mxu0 %vm334_vm3, %v1200_v26 }
 0x196   : > { %4284 = vmatpush3.bf16.msra.mxu1 %v4738_v14  ;;  %4287 = vmatpush3.bf16.msra.mxu0 %v4717_v7 }
 0x197   : > { %4105 = vmatprep.mubr.msk.f32.mxu0 %vm4546_vm2, %v4544_v0  ;;  %4098 = vmatprep.mubr.msk.f32.mxu1 %vm4546_vm2, %v4544_v0 }
 0x198   : > { %v1704_v27 = vpop.permute.xlu1 %1703  ;;  %v1415_v28 = vpop.permute.xlu0 %1414  ;;  %4288 = vmatprep.subr.bf16.mxu1 %v4545_v8  ;;  %4291 = vmatprep.subr.bf16.mxu0 %v4545_v8 }
 0x199   : > { %4099 = vmatmul.mubr.msk.f32.vlgmr.msra.gmra.mrb[10].mxu1 %vm334_vm3, %v1274_v23  ;;  %4106 = vmatmul.mubr.msk.f32.vlgmr.msra.gmra.mrb[12].mxu0 %vm334_vm3, %v1415_v28 }
 0x19a   : > { %4290 = vmatpush3.bf16.msra.mxu1 %v4738_v14  ;;  %4293 = vmatpush3.bf16.msra.mxu0 %v4717_v7 }
 0x19b   : > { %4119 = vmatprep.mubr.msk.f32.mxu0 %vm4546_vm2, %v4544_v0  ;;  %4112 = vmatprep.mubr.msk.f32.mxu1 %vm4546_vm2, %v4544_v0 }
 0x19c   : > { %v1919_v29 = vpop.permute.xlu1 %1918  ;;  %v1630_v30 = vpop.permute.xlu0 %1629  ;;  %4294 = vmatprep.subr.bf16.mxu1 %v4545_v8  ;;  %4297 = vmatprep.subr.bf16.mxu0 %v4545_v8 }
 0x19d   : > { %4113 = vmatmul.mubr.msk.f32.vlgmr.msra.gmra.mrb[12].mxu1 %vm334_vm3, %v1489_v25  ;;  %4120 = vmatmul.mubr.msk.f32.vlgmr.msra.gmra.mrb[14].mxu0 %vm334_vm3, %v1630_v30 }
 0x19e   : > { %4296 = vmatpush3.bf16.msra.mxu1 %v4738_v14  ;;  %4299 = vmatpush3.bf16.msra.mxu0 %v4717_v7 }
 0x19f   : > { %4133 = vmatprep.mubr.msk.f32.mxu0 %vm4546_vm2, %v4544_v0  ;;  %4126 = vmatprep.mubr.msk.f32.mxu1 %vm4546_vm2, %v4544_v0 }
 0x1a0   : > { %v2347_v31 = vpop.permute.xlu1 %2346  ;;  %v1845_v32 = vpop.permute.xlu0 %1844  ;;  %4300 = vmatprep.subr.bf16.mxu1 %v4545_v8  ;;  %4303 = vmatprep.subr.bf16.mxu0 %v4545_v8 }
 0x1a1   : > { %4127 = vmatmul.mubr.msk.f32.vlgmr.msra.gmra.mrb[14].mxu1 %vm334_vm3, %v1704_v27  ;;  %4134 = vmatmul.mubr.msk.f32.vlgmr.msra.gmra.mrb[16].mxu0 %vm334_vm3, %v1845_v32 }
 0x1a2   : > { %4302 = vmatpush3.bf16.msra.mxu1 %v4738_v14  ;;  %4305 = vmatpush3.bf16.msra.mxu0 %v4717_v7 }
 0x1a3   : > { %4140 = vmatprep.mubr.msk.f32.mxu1 %vm4546_vm2, %v4544_v0  ;;  %4147 = vmatprep.mubr.msk.f32.mxu0 %vm4546_vm2, %v4544_v0 }
 0x1a4   : > { %4306 = vmatprep.subr.bf16.mxu1 %v4545_v8  ;;  %v2273_v33 = vpop.permute.xlu0 %2272  ;;  %4309 = vmatprep.subr.bf16.mxu0 %v4545_v8  ;;  %v2562_v34 = vpop.permute.xlu1 %2561 }
 0x1a5   : > { %4141 = vmatmul.mubr.msk.f32.vlgmr.msra.gmra.mrb[16].mxu1 %vm334_vm3, %v1919_v29  ;;  %4148 = vmatmul.mubr.msk.f32.vlgmr.msra.gmra.mrb[18].mxu0 %vm334_vm3, %v4741_v16 }
 0x1a6   : > { %4308 = vmatpush3.bf16.msra.mxu1 %v4738_v14  ;;  %4311 = vmatpush3.bf16.msra.mxu0 %v4717_v7 }
 0x1a7   : > { %4154 = vmatprep.mubr.msk.f32.mxu1 %vm4546_vm2, %v4544_v0  ;;  %4312 = vmatprep.subr.bf16.mxu1 %v4545_v8 }
 0x1a8   : > { %v2488_v35 = vpop.permute.xlu0 %2487  ;;  %4161 = vmatprep.mubr.msk.f32.mxu0 %vm4546_vm2, %v4544_v0  ;;  %4315 = vmatprep.subr.bf16.mxu0 %v4545_v8  ;;  %v2777_v36 = vpop.permute.xlu1 %2776 }
 0x1a9   : > { %4155 = vmatmul.mubr.msk.f32.vlgmr.msra.gmra.mrb[18].mxu1 %vm334_vm3, %v4736_v13  ;;  %4162 = vmatmul.mubr.msk.f32.vlgmr.msra.gmra.mrb[20].mxu0 %vm334_vm3, %v2273_v33 }
 0x1aa   : > { %4314 = vmatpush3.bf16.msra.mxu1 %v4738_v14  ;;  %4317 = vmatpush3.bf16.msra.mxu0 %v4717_v7 }
 0x1ab   : > { %4168 = vmatprep.mubr.msk.f32.mxu1 %vm4546_vm2, %v4544_v0  ;;  %4318 = vmatprep.subr.bf16.mxu1 %v4545_v8 }
 0x1ac   : > { %v2703_v37 = vpop.permute.xlu0 %2702  ;;  %4175 = vmatprep.mubr.msk.f32.mxu0 %vm4546_vm2, %v4544_v0  ;;  %4321 = vmatprep.subr.bf16.mxu0 %v4545_v8  ;;  %v2992_v39 = vpop.permute.xlu1 %2991 }
 0x1ad   : > { %4169 = vmatmul.mubr.msk.f32.vlgmr.msra.gmra.mrb[20].mxu1 %vm334_vm3, %v2347_v31  ;;  %4176 = vmatmul.mubr.msk.f32.vlgmr.msra.gmra.mrb[22].mxu0 %vm334_vm3, %v2488_v35 }
 0x1ae   : > { %4320 = vmatpush3.bf16.msra.mxu1 %v4738_v14  ;;  %4323 = vmatpush3.bf16.msra.mxu0 %v4717_v7 }
 0x1af   : > { %4182 = vmatprep.mubr.msk.f32.mxu1 %vm4546_vm2, %v4544_v0  ;;  %4324 = vmatprep.subr.bf16.mxu1 %v4545_v8 }
 0x1b0   : > { %v2918_v38 = vpop.permute.xlu0 %2917  ;;  %4189 = vmatprep.mubr.msk.f32.mxu0 %vm4546_vm2, %v4544_v0  ;;  %4327 = vmatprep.subr.bf16.mxu0 %v4545_v8  ;;  %v3207_v41 = vpop.permute.xlu1 %3206 }
 0x1b1   : > { %4183 = vmatmul.mubr.msk.f32.vlgmr.msra.gmra.mrb[22].mxu1 %vm334_vm3, %v2562_v34  ;;  %4190 = vmatmul.mubr.msk.f32.vlgmr.msra.gmra.mrb[24].mxu0 %vm334_vm3, %v2703_v37 }
 0x1b2   : > { %4326 = vmatpush3.bf16.msra.mxu1 %v4738_v14  ;;  %4329 = vmatpush3.bf16.msra.mxu0 %v4717_v7 }
 0x1b3   : > { %4196 = vmatprep.mubr.msk.f32.mxu1 %vm4546_vm2, %v4544_v0  ;;  %4330 = vmatprep.subr.bf16.mxu1 %v4545_v8 }
 0x1b4   : > { %v3133_v40 = vpop.permute.xlu0 %3132  ;;  %4203 = vmatprep.mubr.msk.f32.mxu0 %vm4546_vm2, %v4544_v0  ;;  %4333 = vmatprep.subr.bf16.mxu0 %v4545_v8  ;;  %v3422_v43 = vpop.permute.xlu1 %3421 }
 0x1b5   : > { %4197 = vmatmul.mubr.msk.f32.vlgmr.msra.gmra.mrb[24].mxu1 %vm334_vm3, %v2777_v36  ;;  %4204 = vmatmul.mubr.msk.f32.vlgmr.msra.gmra.mrb[26].mxu0 %vm334_vm3, %v2918_v38 }
 0x1b6   : > { %4332 = vmatpush3.bf16.msra.mxu1 %v4738_v14  ;;  %4335 = vmatpush3.bf16.msra.mxu0 %v4717_v7 }
 0x1b7   : > { %4210 = vmatprep.mubr.msk.f32.mxu1 %vm4546_vm2, %v4544_v0  ;;  %4336 = vmatprep.subr.bf16.mxu1 %v4545_v8 }
 0x1b8   : > { %4217 = vmatprep.mubr.msk.f32.mxu0 %vm4546_vm2, %v4544_v0  ;;  %4339 = vmatprep.subr.bf16.mxu0 %v4545_v8  ;;  %v3348_v42 = vpop.permute.xlu0 %3347  ;;  %v3637_v45 = vpop.permute.xlu1 %3636 }
 0x1b9   : > { %4211 = vmatmul.mubr.msk.f32.vlgmr.msra.gmra.mrb[26].mxu1 %vm334_vm3, %v2992_v39  ;;  %4218 = vmatmul.mubr.msk.f32.vlgmr.msra.gmra.mrb[28].mxu0 %vm334_vm3, %v3133_v40 }
 0x1ba   : > { %4338 = vmatpush3.bf16.msra.mxu1 %v4738_v14  ;;  %4341 = vmatpush3.bf16.msra.mxu0 %v4717_v7 }
 0x1bb   : > { %4224 = vmatprep.mubr.msk.f32.mxu1 %vm4546_vm2, %v4544_v0  ;;  %4342 = vmatprep.subr.bf16.mxu1 %v4545_v8 }
 0x1bc   : > { %4231 = vmatprep.mubr.msk.f32.mxu0 %vm4546_vm2, %v4544_v0  ;;  %4345 = vmatprep.subr.bf16.mxu0 %v4545_v8  ;;  %v3563_v44 = vpop.permute.xlu0 %3562 }
 0x1bd   : > { %4225 = vmatmul.mubr.msk.f32.vlgmr.msra.gmra.mrb[28].mxu1 %vm334_vm3, %v3207_v41  ;;  %4232 = vmatmul.mubr.msk.f32.vlgmr.msra.gmra.mrb[30].mxu0 %vm334_vm3, %v3348_v42 }
 0x1be   : > { %4344 = vmatpush3.bf16.msra.mxu1 %v4738_v14  ;;  %4347 = vmatpush3.bf16.msra.mxu0 %v4717_v7 }
 0x1bf   : > { %4238 = vmatprep.mubr.msk.f32.mxu1 %vm4546_vm2, %v4544_v0  ;;  %4245 = vmatprep.mubr.msk.f32.mxu0 %vm4546_vm2, %v4544_v0 }
 0x1c0   : > { %4348 = vmatprep.subr.bf16.mxu1 %v4545_v8 }
 0x1c1   : > { %4239 = vmatmul.mubr.msk.f32.vlgmr.msra.gmra.mrb[30].mxu1 %vm334_vm3, %v3422_v43  ;;  %4246 = vmatmul.mubr.msk.f32.vlgmr.msra.gmra.mrb[32].mxu0 %vm334_vm3, %v3563_v44 }
 0x1c2   : > { %4350 = vmatpush3.bf16.msra.mxu1 %v4738_v14  ;;  %4252 = vmatprep.mubr.msk.f32.mxu1 %vm4546_vm2, %v4544_v0 }
 0x1c5   : > { %4253 = vmatmul.mubr.msk.f32.vlgmr.msra.gmra.mrb[32].mxu1 %vm334_vm3, %v3637_v45 }
 0x1cd   : > { %v4914_v54 = vpop.permute.xlu0 %483 }
 0x1ea   : > { %v404_v49 = vpop.f32.mrb[0].mxu1 }
 0x1eb   : > { %v4037_v50 = vpop.f32.mrb[1].mxu1 }
 0x1ee   : > { %v477_v53 = vpop.f32.mrb[2].mxu1 }
 0x1ef   : > { %v478_v55 = vadd.f32 %v477_v53, %v404_v49  ;;  %v4044_v56 = vpop.f32.mrb[3].mxu1 }
 0x1f1   : > { %v486_v58 = vadd.f32 %v4914_v54, %v478_v55 }
 0x1f3   : > { %v494_v59 = vrot.slane %v486_v58, %v4916_v57  ;;  %v521_v60 = vcombine.high %v486_v58, %v486_v58 }
 0x1f5   : > { %v495_v61 = vcombine.high %v494_v59, %v494_v59  ;;  %v502_v62 = vrot.slane %v494_v59, %v4916_v57  ;;  %v528_v63 = vrot.slane %v521_v60, %v4916_v57 }
 0x1f7   : > { %v509_v0 = vrot.slane %v495_v61, %v4916_v57  ;;  %v510_v1 = vcombine.high %v502_v62, %v502_v62  ;;  %517 = vst.msk [vmem:[%s4924_s6] sm:$0x1] %vm516_vm4, %v502_v62  ;;  %v529_v2 = vcombine.high %v528_v63, %v528_v63  ;;  %v536_v3 = vrot.slane %v528_v63, %v4916_v57 }
 0x1f9   : > { %v511_v4 = vcombine.high %v509_v0, %v509_v0  ;;  %518 = vst.msk [vmem:[%s4924_s6 + $0x20] sm:$0x1] %vm516_vm4, %v509_v0  ;;  %519 = vst.msk [vmem:[%s4924_s6 + $0x40] sm:$0x1] %vm516_vm4, %v510_v1  ;;  %v543_v5 = vrot.slane %v529_v2, %v4916_v57  ;;  %v544_v6 = vcombine.high %v536_v3, %v536_v3 }
 0x1fa   : > { %550 = vst.msk [vmem:[%s4924_s6 + $0x1] sm:$0x1] %vm516_vm4, %v536_v3 }
 0x1fb   : > { %520 = vst.msk [vmem:[%s4924_s6 + $0x60] sm:$0x1] %vm516_vm4, %v511_v4  ;;  %v545_v7 = vcombine.high %v543_v5, %v543_v5  ;;  %551 = vst.msk [vmem:[%s4924_s6 + $0x21] sm:$0x1] %vm516_vm4, %v543_v5 }
 0x1fc   : > { %552 = vst.msk [vmem:[%s4924_s6 + $0x41] sm:$0x1] %vm516_vm4, %v544_v6 }
 0x1fd   : > { %553 = vst.msk [vmem:[%s4924_s6 + $0x61] sm:$0x1] %vm516_vm4, %v545_v7 }
 0x25c   : > { %v624_v8 = vpop.f32.mrb[4].mxu0 }
 0x25d   : > { %v4051_v9 = vpop.f32.mrb[5].mxu0 }
 0x260   : > { %v698_v10 = vpop.f32.mrb[4].mxu1  ;;  %v839_v11 = vpop.f32.mrb[6].mxu0 }
 0x261   : > { %v699_v12 = vadd.f32 %v698_v10, %v624_v8  ;;  %v4058_v13 = vpop.f32.mrb[5].mxu1  ;;  %v4065_v14 = vpop.f32.mrb[7].mxu0 }
 0x263   : > { %v702_v15 = vadd.f32 %v699_v12, %v4914_v54 }
 0x264   : > { %v913_v16 = vpop.f32.mrb[6].mxu1  ;;  %v1054_v17 = vpop.f32.mrb[8].mxu0 }
 0x265   : > { %v710_v18 = vrot.slane %v702_v15, %v4916_v57  ;;  %v736_v19 = vcombine.high %v702_v15, %v702_v15  ;;  %v914_v20 = vadd.f32 %v913_v16, %v839_v11  ;;  %v4072_v21 = vpop.f32.mrb[7].mxu1  ;;  %v4079_v22 = vpop.f32.mrb[9].mxu0 }
 0x267   : > { %v711_v23 = vcombine.high %v710_v18, %v710_v18  ;;  %v718_v24 = vrot.slane %v710_v18, %v4916_v57  ;;  %v743_v25 = vrot.slane %v736_v19, %v4916_v57  ;;  %v917_v26 = vadd.f32 %v914_v20, %v4914_v54 }
 0x268   : > { %v1128_v27 = vpop.f32.mrb[8].mxu1  ;;  %v1269_v28 = vpop.f32.mrb[10].mxu0 }
 0x269   : > { %v725_v29 = vrot.slane %v711_v23, %v4916_v57  ;;  %v726_v30 = vcombine.high %v718_v24, %v718_v24  ;;  %732 = vst.msk [vmem:[%s4924_s6 + $0x2] sm:$0x1] %vm516_vm4, %v718_v24  ;;  %v744_v31 = vcombine.high %v743_v25, %v743_v25  ;;  %v751_v32 = vrot.slane %v743_v25, %v4916_v57  ;;  %v4086_v33 = vpop.f32.mrb[9].mxu1  ;;  %v4093_v34 = vpop.f32.mrb[11].mxu0 }
 0x26a   : > { %v925_v35 = vrot.slane %v917_v26, %v4916_v57  ;;  %v951_v36 = vcombine.high %v917_v26, %v917_v26  ;;  %v1129_v37 = vadd.f32 %v1128_v27, %v1054_v17 }
 0x26b   : > { %v727_v38 = vcombine.high %v725_v29, %v725_v29  ;;  %733 = vst.msk [vmem:[%s4924_s6 + $0x22] sm:$0x1] %vm516_vm4, %v725_v29  ;;  %734 = vst.msk [vmem:[%s4924_s6 + $0x42] sm:$0x1] %vm516_vm4, %v726_v30  ;;  %v758_v39 = vrot.slane %v744_v31, %v4916_v57  ;;  %v759_v40 = vcombine.high %v751_v32, %v751_v32 }
 0x26c   : > { %765 = vst.msk [vmem:[%s4924_s6 + $0x3] sm:$0x1] %vm516_vm4, %v751_v32  ;;  %v926_v41 = vcombine.high %v925_v35, %v925_v35  ;;  %v933_v42 = vrot.slane %v925_v35, %v4916_v57  ;;  %v958_v43 = vrot.slane %v951_v36, %v4916_v57  ;;  %v1132_v44 = vadd.f32 %v1129_v37, %v4914_v54  ;;  %v1343_v45 = vpop.f32.mrb[10].mxu1  ;;  %v1484_v46 = vpop.f32.mrb[12].mxu0 }
 0x26d   : > { %735 = vst.msk [vmem:[%s4924_s6 + $0x62] sm:$0x1] %vm516_vm4, %v727_v38  ;;  %v760_v47 = vcombine.high %v758_v39, %v758_v39  ;;  %766 = vst.msk [vmem:[%s4924_s6 + $0x23] sm:$0x1] %vm516_vm4, %v758_v39  ;;  %v1344_v48 = vadd.f32 %v1343_v45, %v1269_v28  ;;  %v4100_v49 = vpop.f32.mrb[11].mxu1  ;;  %v4107_v50 = vpop.f32.mrb[13].mxu0 }
 0x26e   : > { %767 = vst.msk [vmem:[%s4924_s6 + $0x43] sm:$0x1] %vm516_vm4, %v759_v40  ;;  %v940_v51 = vrot.slane %v926_v41, %v4916_v57  ;;  %v941_v52 = vcombine.high %v933_v42, %v933_v42  ;;  %947 = vst.msk [vmem:[%s4924_s6 + $0x4] sm:$0x1] %vm516_vm4, %v933_v42  ;;  %v959_v53 = vcombine.high %v958_v43, %v958_v43 }
 0x26f   : > { %v966_v55 = vrot.slane %v958_v43, %v4916_v57  ;;  %768 = vst.msk [vmem:[%s4924_s6 + $0x63] sm:$0x1] %vm516_vm4, %v760_v47  ;;  %v1140_v56 = vrot.slane %v1132_v44, %v4916_v57  ;;  %v1166_v58 = vcombine.high %v1132_v44, %v1132_v44  ;;  %v1347_v59 = vadd.f32 %v1344_v48, %v4914_v54 }
 0x270   : > { %v942_v60 = vcombine.high %v940_v51, %v940_v51  ;;  %948 = vst.msk [vmem:[%s4924_s6 + $0x24] sm:$0x1] %vm516_vm4, %v940_v51  ;;  %949 = vst.msk [vmem:[%s4924_s6 + $0x44] sm:$0x1] %vm516_vm4, %v941_v52  ;;  %v973_v61 = vrot.slane %v959_v53, %v4916_v57  ;;  %v1558_v63 = vpop.f32.mrb[12].mxu1  ;;  %v1699_v0 = vpop.f32.mrb[14].mxu0 }
 0x271   : > { %v974_v62 = vcombine.high %v966_v55, %v966_v55  ;;  %980 = vst.msk [vmem:[%s4924_s6 + $0x5] sm:$0x1] %vm516_vm4, %v966_v55  ;;  %v1141_v1 = vcombine.high %v1140_v56, %v1140_v56  ;;  %v1148_v2 = vrot.slane %v1140_v56, %v4916_v57  ;;  %v1173_v3 = vrot.slane %v1166_v58, %v4916_v57  ;;  %v4114_v5 = vpop.f32.mrb[13].mxu1  ;;  %v4121_v6 = vpop.f32.mrb[15].mxu0 }
 0x272   : > { %v1355_v4 = vrot.slane %v1347_v59, %v4916_v57  ;;  %950 = vst.msk [vmem:[%s4924_s6 + $0x64] sm:$0x1] %vm516_vm4, %v942_v60  ;;  %v975_v7 = vcombine.high %v973_v61, %v973_v61  ;;  %981 = vst.msk [vmem:[%s4924_s6 + $0x25] sm:$0x1] %vm516_vm4, %v973_v61  ;;  %v1381_v8 = vcombine.high %v1347_v59, %v1347_v59 }
 0x273   : > { %982 = vst.msk [vmem:[%s4924_s6 + $0x45] sm:$0x1] %vm516_vm4, %v974_v62  ;;  %v1559_v9 = vadd.f32 %v1558_v63, %v1484_v46  ;;  %v1155_v10 = vrot.slane %v1141_v1, %v4916_v57  ;;  %v1156_v11 = vcombine.high %v1148_v2, %v1148_v2  ;;  %1162 = vst.msk [vmem:[%s4924_s6 + $0x6] sm:$0x1] %vm516_vm4, %v1148_v2 }
 0x274   : > { %v1174_v12 = vcombine.high %v1173_v3, %v1173_v3  ;;  %v1181_v13 = vrot.slane %v1173_v3, %v4916_v57  ;;  %983 = vst.msk [vmem:[%s4924_s6 + $0x65] sm:$0x1] %vm516_vm4, %v975_v7  ;;  %v1356_v14 = vcombine.high %v1355_v4, %v1355_v4  ;;  %v1363_v15 = vrot.slane %v1355_v4, %v4916_v57  ;;  %v1773_v18 = vpop.f32.mrb[14].mxu1  ;;  %v1914_v19 = vpop.f32.mrb[16].mxu0 }
 0x275   : > { %v1388_v16 = vrot.slane %v1381_v8, %v4916_v57  ;;  %v1562_v17 = vadd.f32 %v1559_v9, %v4914_v54  ;;  %v1157_v20 = vcombine.high %v1155_v10, %v1155_v10  ;;  %1163 = vst.msk [vmem:[%s4924_s6 + $0x26] sm:$0x1] %vm516_vm4, %v1155_v10  ;;  %1164 = vst.msk [vmem:[%s4924_s6 + $0x46] sm:$0x1] %vm516_vm4, %v1156_v11  ;;  %v4128_v24 = vpop.f32.mrb[15].mxu1  ;;  %v4135_v25 = vpop.f32.mrb[17].mxu0 }
 0x276   : > { %v1188_v21 = vrot.slane %v1174_v12, %v4916_v57  ;;  %v1189_v22 = vcombine.high %v1181_v13, %v1181_v13  ;;  %1195 = vst.msk [vmem:[%s4924_s6 + $0x7] sm:$0x1] %vm516_vm4, %v1181_v13  ;;  %v1774_v23 = vadd.f32 %v1773_v18, %v1699_v0  ;;  %v1370_v26 = vrot.slane %v1356_v14, %v4916_v57 }
 0x277   : > { %v1371_v27 = vcombine.high %v1363_v15, %v1363_v15  ;;  %1377 = vst.msk [vmem:[%s4924_s6 + $0x8] sm:$0x1] %vm516_vm4, %v1363_v15  ;;  %v1389_v28 = vcombine.high %v1388_v16, %v1388_v16  ;;  %v1396_v29 = vrot.slane %v1388_v16, %v4916_v57  ;;  %1165 = vst.msk [vmem:[%s4924_s6 + $0x66] sm:$0x1] %vm516_vm4, %v1157_v20 }
 0x278   : > { %v1190_v30 = vcombine.high %v1188_v21, %v1188_v21  ;;  %1196 = vst.msk [vmem:[%s4924_s6 + $0x27] sm:$0x1] %vm516_vm4, %v1188_v21  ;;  %1197 = vst.msk [vmem:[%s4924_s6 + $0x47] sm:$0x1] %vm516_vm4, %v1189_v22  ;;  %v1570_v31 = vrot.slane %v1562_v17, %v4916_v57  ;;  %v1596_v32 = vcombine.high %v1562_v17, %v1562_v17  ;;  %v1988_v37 = vpop.f32.mrb[16].mxu1  ;;  %v2128_v38 = vpop.f32.mrb[18].mxu0 }
 0x279   : > { %v1777_v33 = vadd.f32 %v1774_v23, %v4914_v54  ;;  %v1372_v34 = vcombine.high %v1370_v26, %v1370_v26  ;;  %1378 = vst.msk [vmem:[%s4924_s6 + $0x28] sm:$0x1] %vm516_vm4, %v1370_v26  ;;  %1379 = vst.msk [vmem:[%s4924_s6 + $0x48] sm:$0x1] %vm516_vm4, %v1371_v27  ;;  %v1403_v35 = vrot.slane %v1389_v28, %v4916_v57  ;;  %v4142_v43 = vpop.f32.mrb[17].mxu1  ;;  %v4149_v44 = vpop.f32.mrb[19].mxu0 }
 0x27a   : > { %v1404_v36 = vcombine.high %v1396_v29, %v1396_v29  ;;  %1410 = vst.msk [vmem:[%s4924_s6 + $0x9] sm:$0x1] %vm516_vm4, %v1396_v29  ;;  %1198 = vst.msk [vmem:[%s4924_s6 + $0x67] sm:$0x1] %vm516_vm4, %v1190_v30  ;;  %v1571_v39 = vcombine.high %v1570_v31, %v1570_v31  ;;  %v1578_v40 = vrot.slane %v1570_v31, %v4916_v57 }
 0x27b   : > { %v1603_v41 = vrot.slane %v1596_v32, %v4916_v57  ;;  %v1785_v42 = vrot.slane %v1777_v33, %v4916_v57  ;;  %1380 = vst.msk [vmem:[%s4924_s6 + $0x68] sm:$0x1] %vm516_vm4, %v1372_v34  ;;  %v1405_v45 = vcombine.high %v1403_v35, %v1403_v35  ;;  %1411 = vst.msk [vmem:[%s4924_s6 + $0x29] sm:$0x1] %vm516_vm4, %v1403_v35 }
 0x27c   : > { %1412 = vst.msk [vmem:[%s4924_s6 + $0x49] sm:$0x1] %vm516_vm4, %v1404_v36  ;;  %v1811_v46 = vcombine.high %v1777_v33, %v1777_v33  ;;  %v1989_v47 = vadd.f32 %v1988_v37, %v1914_v19  ;;  %v1585_v48 = vrot.slane %v1571_v39, %v4916_v57  ;;  %v1586_v49 = vcombine.high %v1578_v40, %v1578_v40  ;;  %v2201_v58 = vpop.f32.mrb[18].mxu1  ;;  %v2342_v59 = vpop.f32.mrb[20].mxu0 }
 0x27d   : > { %1592 = vst.msk [vmem:[%s4924_s6 + $0xa] sm:$0x1] %vm516_vm4, %v1578_v40  ;;  %v1604_v50 = vcombine.high %v1603_v41, %v1603_v41  ;;  %v1611_v51 = vrot.slane %v1603_v41, %v4916_v57  ;;  %1413 = vst.msk [vmem:[%s4924_s6 + $0x69] sm:$0x1] %vm516_vm4, %v1405_v45  ;;  %v1786_v52 = vcombine.high %v1785_v42, %v1785_v42  ;;  %v4156_v0 = vpop.f32.mrb[19].mxu1  ;;  %v4163_v1 = vpop.f32.mrb[21].mxu0 }
 0x27e   : > { %v1793_v53 = vrot.slane %v1785_v42, %v4916_v57  ;;  %v1818_v55 = vrot.slane %v1811_v46, %v4916_v57  ;;  %v1992_v56 = vadd.f32 %v1989_v47, %v4914_v54  ;;  %v1587_v60 = vcombine.high %v1585_v48, %v1585_v48  ;;  %1593 = vst.msk [vmem:[%s4924_s6 + $0x2a] sm:$0x1] %vm516_vm4, %v1585_v48 }
 0x27f   : > { %1594 = vst.msk [vmem:[%s4924_s6 + $0x4a] sm:$0x1] %vm516_vm4, %v1586_v49  ;;  %v1618_v61 = vrot.slane %v1604_v50, %v4916_v57  ;;  %v1619_v62 = vcombine.high %v1611_v51, %v1611_v51  ;;  %1625 = vst.msk [vmem:[%s4924_s6 + $0xb] sm:$0x1] %vm516_vm4, %v1611_v51  ;;  %v2202_v63 = vadd.f32 %v2201_v58, %v2128_v38 }
 0x280   : > { %v1800_v2 = vrot.slane %v1786_v52, %v4916_v57  ;;  %v1801_v3 = vcombine.high %v1793_v53, %v1793_v53  ;;  %1807 = vst.msk [vmem:[%s4924_s6 + $0xc] sm:$0x1] %vm516_vm4, %v1793_v53  ;;  %v1819_v4 = vcombine.high %v1818_v55, %v1818_v55  ;;  %v1826_v5 = vrot.slane %v1818_v55, %v4916_v57  ;;  %v2416_v13 = vpop.f32.mrb[20].mxu1  ;;  %v2557_v14 = vpop.f32.mrb[22].mxu0 }
 0x281   : > { %1595 = vst.msk [vmem:[%s4924_s6 + $0x6a] sm:$0x1] %vm516_vm4, %v1587_v60  ;;  %v1620_v6 = vcombine.high %v1618_v61, %v1618_v61  ;;  %1626 = vst.msk [vmem:[%s4924_s6 + $0x2b] sm:$0x1] %vm516_vm4, %v1618_v61  ;;  %v2000_v7 = vrot.slane %v1992_v56, %v4916_v57  ;;  %v2026_v8 = vcombine.high %v1992_v56, %v1992_v56  ;;  %v4170_v19 = vpop.f32.mrb[21].mxu1  ;;  %v4177_v20 = vpop.f32.mrb[23].mxu0 }
 0x282   : > { %1627 = vst.msk [vmem:[%s4924_s6 + $0x4b] sm:$0x1] %vm516_vm4, %v1619_v62  ;;  %v2205_v9 = vadd.f32 %v2202_v63, %v4914_v54  ;;  %v1802_v10 = vcombine.high %v1800_v2, %v1800_v2  ;;  %1808 = vst.msk [vmem:[%s4924_s6 + $0x2c] sm:$0x1] %vm516_vm4, %v1800_v2  ;;  %v1833_v11 = vrot.slane %v1819_v4, %v4916_v57 }
 0x283   : > { %1809 = vst.msk [vmem:[%s4924_s6 + $0x4c] sm:$0x1] %vm516_vm4, %v1801_v3  ;;  %v1834_v12 = vcombine.high %v1826_v5, %v1826_v5  ;;  %1840 = vst.msk [vmem:[%s4924_s6 + $0xd] sm:$0x1] %vm516_vm4, %v1826_v5  ;;  %v2001_v15 = vcombine.high %v2000_v7, %v2000_v7  ;;  %v2008_v16 = vrot.slane %v2000_v7, %v4916_v57 }
 0x284   : > { %1628 = vst.msk [vmem:[%s4924_s6 + $0x6b] sm:$0x1] %vm516_vm4, %v1620_v6  ;;  %v2033_v17 = vrot.slane %v2026_v8, %v4916_v57  ;;  %v2213_v18 = vrot.slane %v2205_v9, %v4916_v57  ;;  %1810 = vst.msk [vmem:[%s4924_s6 + $0x6c] sm:$0x1] %vm516_vm4, %v1802_v10  ;;  %v1835_v21 = vcombine.high %v1833_v11, %v1833_v11  ;;  %v2631_v32 = vpop.f32.mrb[22].mxu1  ;;  %v2772_v33 = vpop.f32.mrb[24].mxu0 }
 0x285   : > { %1841 = vst.msk [vmem:[%s4924_s6 + $0x2d] sm:$0x1] %vm516_vm4, %v1833_v11  ;;  %1842 = vst.msk [vmem:[%s4924_s6 + $0x4d] sm:$0x1] %vm516_vm4, %v1834_v12  ;;  %v2239_v22 = vcombine.high %v2205_v9, %v2205_v9  ;;  %v2417_v23 = vadd.f32 %v2416_v13, %v2342_v59  ;;  %v2015_v24 = vrot.slane %v2001_v15, %v4916_v57  ;;  %v4184_v38 = vpop.f32.mrb[23].mxu1  ;;  %v4191_v39 = vpop.f32.mrb[25].mxu0 }
 0x286   : > { %v2016_v25 = vcombine.high %v2008_v16, %v2008_v16  ;;  %2022 = vst.msk [vmem:[%s4924_s6 + $0xe] sm:$0x1] %vm516_vm4, %v2008_v16  ;;  %v2034_v26 = vcombine.high %v2033_v17, %v2033_v17  ;;  %v2041_v27 = vrot.slane %v2033_v17, %v4916_v57  ;;  %1843 = vst.msk [vmem:[%s4924_s6 + $0x6d] sm:$0x1] %vm516_vm4, %v1835_v21 }
 0x287   : > { %v2214_v28 = vcombine.high %v2213_v18, %v2213_v18  ;;  %v2221_v29 = vrot.slane %v2213_v18, %v4916_v57  ;;  %v2246_v30 = vrot.slane %v2239_v22, %v4916_v57  ;;  %v2420_v31 = vadd.f32 %v2417_v23, %v4914_v54  ;;  %2023 = vst.msk [vmem:[%s4924_s6 + $0x2e] sm:$0x1] %vm516_vm4, %v2015_v24 }
 0x288   : > { %v2017_v34 = vcombine.high %v2015_v24, %v2015_v24  ;;  %2024 = vst.msk [vmem:[%s4924_s6 + $0x4e] sm:$0x1] %vm516_vm4, %v2016_v25  ;;  %v2048_v35 = vrot.slane %v2034_v26, %v4916_v57  ;;  %v2049_v36 = vcombine.high %v2041_v27, %v2041_v27  ;;  %2055 = vst.msk [vmem:[%s4924_s6 + $0xf] sm:$0x1] %vm516_vm4, %v2041_v27  ;;  %v2846_v51 = vpop.f32.mrb[24].mxu1  ;;  %v2987_v52 = vpop.f32.mrb[26].mxu0 }
 0x289   : > { %v2632_v37 = vadd.f32 %v2631_v32, %v2557_v14  ;;  %v2228_v40 = vrot.slane %v2214_v28, %v4916_v57  ;;  %v2229_v41 = vcombine.high %v2221_v29, %v2221_v29  ;;  %2235 = vst.msk [vmem:[%s4924_s6 + $0x10] sm:$0x1] %vm516_vm4, %v2221_v29  ;;  %v2247_v42 = vcombine.high %v2246_v30, %v2246_v30  ;;  %v4198_v59 = vpop.f32.mrb[25].mxu1  ;;  %v4205_v60 = vpop.f32.mrb[27].mxu0 }
 0x28a   : > { %v2254_v43 = vrot.slane %v2246_v30, %v4916_v57  ;;  %2025 = vst.msk [vmem:[%s4924_s6 + $0x6e] sm:$0x1] %vm516_vm4, %v2017_v34  ;;  %v2050_v44 = vcombine.high %v2048_v35, %v2048_v35  ;;  %2056 = vst.msk [vmem:[%s4924_s6 + $0x2f] sm:$0x1] %vm516_vm4, %v2048_v35  ;;  %v2428_v45 = vrot.slane %v2420_v31, %v4916_v57 }
 0x28b   : > { %2057 = vst.msk [vmem:[%s4924_s6 + $0x4f] sm:$0x1] %vm516_vm4, %v2049_v36  ;;  %v2454_v46 = vcombine.high %v2420_v31, %v2420_v31  ;;  %v2635_v47 = vadd.f32 %v2632_v37, %v4914_v54  ;;  %v2230_v48 = vcombine.high %v2228_v40, %v2228_v40  ;;  %2236 = vst.msk [vmem:[%s4924_s6 + $0x30] sm:$0x1] %vm516_vm4, %v2228_v40 }
 0x28c   : > { %2237 = vst.msk [vmem:[%s4924_s6 + $0x50] sm:$0x1] %vm516_vm4, %v2229_v41  ;;  %v2261_v49 = vrot.slane %v2247_v42, %v4916_v57  ;;  %v2262_v50 = vcombine.high %v2254_v43, %v2254_v43  ;;  %2268 = vst.msk [vmem:[%s4924_s6 + $0x11] sm:$0x1] %vm516_vm4, %v2254_v43  ;;  %v2429_v53 = vcombine.high %v2428_v45, %v2428_v45  ;;  %v3061_v8 = vpop.f32.mrb[26].mxu1  ;;  %v3202_v9 = vpop.f32.mrb[28].mxu0 }
 0x28d   : > { %2058 = vst.msk [vmem:[%s4924_s6 + $0x6f] sm:$0x1] %vm516_vm4, %v2050_v44  ;;  %v2436_v55 = vrot.slane %v2428_v45, %v4916_v57  ;;  %v2461_v56 = vrot.slane %v2454_v46, %v4916_v57  ;;  %v2643_v58 = vrot.slane %v2635_v47, %v4916_v57  ;;  %2238 = vst.msk [vmem:[%s4924_s6 + $0x70] sm:$0x1] %vm516_vm4, %v2230_v48  ;;  %v4212_v14 = vpop.f32.mrb[27].mxu1  ;;  %v4219_v15 = vpop.f32.mrb[29].mxu0 }
 0x28e   : > { %v2263_v61 = vcombine.high %v2261_v49, %v2261_v49  ;;  %2269 = vst.msk [vmem:[%s4924_s6 + $0x31] sm:$0x1] %vm516_vm4, %v2261_v49  ;;  %2270 = vst.msk [vmem:[%s4924_s6 + $0x51] sm:$0x1] %vm516_vm4, %v2262_v50  ;;  %v2669_v62 = vcombine.high %v2635_v47, %v2635_v47  ;;  %v2847_v63 = vadd.f32 %v2846_v51, %v2772_v33 }
 0x28f   : > { %v2443_v0 = vrot.slane %v2429_v53, %v4916_v57  ;;  %v2444_v1 = vcombine.high %v2436_v55, %v2436_v55  ;;  %2450 = vst.msk [vmem:[%s4924_s6 + $0x12] sm:$0x1] %vm516_vm4, %v2436_v55  ;;  %v2462_v2 = vcombine.high %v2461_v56, %v2461_v56  ;;  %v2469_v3 = vrot.slane %v2461_v56, %v4916_v57 }
 0x290   : > { %2271 = vst.msk [vmem:[%s4924_s6 + $0x71] sm:$0x1] %vm516_vm4, %v2263_v61  ;;  %v2644_v4 = vcombine.high %v2643_v58, %v2643_v58  ;;  %v2651_v5 = vrot.slane %v2643_v58, %v4916_v57  ;;  %v2676_v6 = vrot.slane %v2669_v62, %v4916_v57  ;;  %v2850_v7 = vadd.f32 %v2847_v63, %v4914_v54  ;;  %v3276_v27 = vpop.f32.mrb[28].mxu1  ;;  %v3417_v28 = vpop.f32.mrb[30].mxu0 }
 0x291   : > { %v2445_v10 = vcombine.high %v2443_v0, %v2443_v0  ;;  %2451 = vst.msk [vmem:[%s4924_s6 + $0x32] sm:$0x1] %vm516_vm4, %v2443_v0  ;;  %2452 = vst.msk [vmem:[%s4924_s6 + $0x52] sm:$0x1] %vm516_vm4, %v2444_v1  ;;  %v2476_v11 = vrot.slane %v2462_v2, %v4916_v57  ;;  %v2477_v12 = vcombine.high %v2469_v3, %v2469_v3  ;;  %v4226_v33 = vpop.f32.mrb[29].mxu1  ;;  %v4233_v34 = vpop.f32.mrb[31].mxu0 }
 0x292   : > { %2483 = vst.msk [vmem:[%s4924_s6 + $0x13] sm:$0x1] %vm516_vm4, %v2469_v3  ;;  %v3062_v13 = vadd.f32 %v3061_v8, %v2987_v52  ;;  %v2658_v16 = vrot.slane %v2644_v4, %v4916_v57  ;;  %v2659_v17 = vcombine.high %v2651_v5, %v2651_v5  ;;  %2665 = vst.msk [vmem:[%s4924_s6 + $0x14] sm:$0x1] %vm516_vm4, %v2651_v5 }
 0x293   : > { %v2677_v18 = vcombine.high %v2676_v6, %v2676_v6  ;;  %v2684_v19 = vrot.slane %v2676_v6, %v4916_v57  ;;  %2453 = vst.msk [vmem:[%s4924_s6 + $0x72] sm:$0x1] %vm516_vm4, %v2445_v10  ;;  %v2478_v20 = vcombine.high %v2476_v11, %v2476_v11  ;;  %2484 = vst.msk [vmem:[%s4924_s6 + $0x33] sm:$0x1] %vm516_vm4, %v2476_v11 }
 0x294   : > { %2485 = vst.msk [vmem:[%s4924_s6 + $0x53] sm:$0x1] %vm516_vm4, %v2477_v12  ;;  %v2858_v21 = vrot.slane %v2850_v7, %v4916_v57  ;;  %v2884_v22 = vcombine.high %v2850_v7, %v2850_v7  ;;  %v3065_v23 = vadd.f32 %v3062_v13, %v4914_v54  ;;  %v2660_v24 = vcombine.high %v2658_v16, %v2658_v16  ;;  %v3491_v46 = vpop.f32.mrb[30].mxu1  ;;  %v3632_v47 = vpop.f32.mrb[32].mxu0 }
 0x295   : > { %2666 = vst.msk [vmem:[%s4924_s6 + $0x34] sm:$0x1] %vm516_vm4, %v2658_v16  ;;  %2667 = vst.msk [vmem:[%s4924_s6 + $0x54] sm:$0x1] %vm516_vm4, %v2659_v17  ;;  %v2691_v25 = vrot.slane %v2677_v18, %v4916_v57  ;;  %v2692_v26 = vcombine.high %v2684_v19, %v2684_v19  ;;  %v3277_v37 = vadd.f32 %v3276_v27, %v3202_v9  ;;  %v4240_v52 = vpop.f32.mrb[31].mxu1  ;;  %v4247_v53 = vpop.f32.mrb[33].mxu0 }
 0x296   : > { %2698 = vst.msk [vmem:[%s4924_s6 + $0x15] sm:$0x1] %vm516_vm4, %v2684_v19  ;;  %2486 = vst.msk [vmem:[%s4924_s6 + $0x73] sm:$0x1] %vm516_vm4, %v2478_v20  ;;  %v2859_v29 = vcombine.high %v2858_v21, %v2858_v21  ;;  %v2866_v30 = vrot.slane %v2858_v21, %v4916_v57  ;;  %v2891_v31 = vrot.slane %v2884_v22, %v4916_v57 }
 0x297   : > { %v3073_v32 = vrot.slane %v3065_v23, %v4916_v57  ;;  %2668 = vst.msk [vmem:[%s4924_s6 + $0x74] sm:$0x1] %vm516_vm4, %v2660_v24  ;;  %v2693_v35 = vcombine.high %v2691_v25, %v2691_v25  ;;  %2699 = vst.msk [vmem:[%s4924_s6 + $0x35] sm:$0x1] %vm516_vm4, %v2691_v25  ;;  %v3099_v36 = vcombine.high %v3065_v23, %v3065_v23 }
 0x298   : > { %2700 = vst.msk [vmem:[%s4924_s6 + $0x55] sm:$0x1] %vm516_vm4, %v2692_v26  ;;  %v2873_v38 = vrot.slane %v2859_v29, %v4916_v57  ;;  %v2874_v39 = vcombine.high %v2866_v30, %v2866_v30  ;;  %2880 = vst.msk [vmem:[%s4924_s6 + $0x16] sm:$0x1] %vm516_vm4, %v2866_v30  ;;  %v2892_v40 = vcombine.high %v2891_v31, %v2891_v31  ;;  %v3706_v3 = vpop.f32.mrb[32].mxu1 }
 0x299   : > { %v2899_v41 = vrot.slane %v2891_v31, %v4916_v57  ;;  %2701 = vst.msk [vmem:[%s4924_s6 + $0x75] sm:$0x1] %vm516_vm4, %v2693_v35  ;;  %v3074_v42 = vcombine.high %v3073_v32, %v3073_v32  ;;  %v3081_v43 = vrot.slane %v3073_v32, %v4916_v57  ;;  %v3106_v44 = vrot.slane %v3099_v36, %v4916_v57  ;;  %v4254_v8 = vpop.f32.mrb[33].mxu1 }
 0x29a   : > { %v3280_v45 = vadd.f32 %v3277_v37, %v4914_v54  ;;  %v2875_v48 = vcombine.high %v2873_v38, %v2873_v38  ;;  %2881 = vst.msk [vmem:[%s4924_s6 + $0x36] sm:$0x1] %vm516_vm4, %v2873_v38  ;;  %2882 = vst.msk [vmem:[%s4924_s6 + $0x56] sm:$0x1] %vm516_vm4, %v2874_v39  ;;  %v2906_v49 = vrot.slane %v2892_v40, %v4916_v57 }
 0x29b   : > { %v2907_v50 = vcombine.high %v2899_v41, %v2899_v41  ;;  %2913 = vst.msk [vmem:[%s4924_s6 + $0x17] sm:$0x1] %vm516_vm4, %v2899_v41  ;;  %v3492_v51 = vadd.f32 %v3491_v46, %v3417_v28  ;;  %v3088_v55 = vrot.slane %v3074_v42, %v4916_v57  ;;  %v3089_v56 = vcombine.high %v3081_v43, %v3081_v43 }
 0x29c   : > { %3095 = vst.msk [vmem:[%s4924_s6 + $0x18] sm:$0x1] %vm516_vm4, %v3081_v43  ;;  %v3107_v58 = vcombine.high %v3106_v44, %v3106_v44  ;;  %v3114_v59 = vrot.slane %v3106_v44, %v4916_v57  ;;  %2883 = vst.msk [vmem:[%s4924_s6 + $0x76] sm:$0x1] %vm516_vm4, %v2875_v48  ;;  %v2908_v60 = vcombine.high %v2906_v49, %v2906_v49 }
 0x29d   : > { %2914 = vst.msk [vmem:[%s4924_s6 + $0x37] sm:$0x1] %vm516_vm4, %v2906_v49  ;;  %2915 = vst.msk [vmem:[%s4924_s6 + $0x57] sm:$0x1] %vm516_vm4, %v2907_v50  ;;  %v3288_v61 = vrot.slane %v3280_v45, %v4916_v57  ;;  %v3314_v62 = vcombine.high %v3280_v45, %v3280_v45  ;;  %v3495_v63 = vadd.f32 %v3492_v51, %v4914_v54 }
 0x29e   : > { %v3090_v0 = vcombine.high %v3088_v55, %v3088_v55  ;;  %3096 = vst.msk [vmem:[%s4924_s6 + $0x38] sm:$0x1] %vm516_vm4, %v3088_v55  ;;  %3097 = vst.msk [vmem:[%s4924_s6 + $0x58] sm:$0x1] %vm516_vm4, %v3089_v56  ;;  %v3121_v1 = vrot.slane %v3107_v58, %v4916_v57  ;;  %v3122_v2 = vcombine.high %v3114_v59, %v3114_v59 }
 0x29f   : > { %3128 = vst.msk [vmem:[%s4924_s6 + $0x19] sm:$0x1] %vm516_vm4, %v3114_v59  ;;  %2916 = vst.msk [vmem:[%s4924_s6 + $0x77] sm:$0x1] %vm516_vm4, %v2908_v60  ;;  %v3289_v4 = vcombine.high %v3288_v61, %v3288_v61  ;;  %v3296_v5 = vrot.slane %v3288_v61, %v4916_v57  ;;  %v3321_v6 = vrot.slane %v3314_v62, %v4916_v57 }
 0x2a0   : > { %v3503_v7 = vrot.slane %v3495_v63, %v4916_v57  ;;  %3098 = vst.msk [vmem:[%s4924_s6 + $0x78] sm:$0x1] %vm516_vm4, %v3090_v0  ;;  %v3123_v9 = vcombine.high %v3121_v1, %v3121_v1  ;;  %3129 = vst.msk [vmem:[%s4924_s6 + $0x39] sm:$0x1] %vm516_vm4, %v3121_v1  ;;  %v3529_v10 = vcombine.high %v3495_v63, %v3495_v63 }
 0x2a1   : > { %3130 = vst.msk [vmem:[%s4924_s6 + $0x59] sm:$0x1] %vm516_vm4, %v3122_v2  ;;  %v3707_v11 = vadd.f32 %v3706_v3, %v3632_v47  ;;  %v3303_v12 = vrot.slane %v3289_v4, %v4916_v57  ;;  %v3304_v13 = vcombine.high %v3296_v5, %v3296_v5  ;;  %3310 = vst.msk [vmem:[%s4924_s6 + $0x1a] sm:$0x1] %vm516_vm4, %v3296_v5 }
 0x2a2   : > { %v3322_v14 = vcombine.high %v3321_v6, %v3321_v6  ;;  %v3329_v15 = vrot.slane %v3321_v6, %v4916_v57  ;;  %3131 = vst.msk [vmem:[%s4924_s6 + $0x79] sm:$0x1] %vm516_vm4, %v3123_v9  ;;  %v3504_v16 = vcombine.high %v3503_v7, %v3503_v7  ;;  %v3511_v17 = vrot.slane %v3503_v7, %v4916_v57 }
 0x2a3   : > { %v3536_v18 = vrot.slane %v3529_v10, %v4916_v57  ;;  %v3710_v19 = vadd.f32 %v3707_v11, %v4914_v54  ;;  %v3305_v20 = vcombine.high %v3303_v12, %v3303_v12  ;;  %3311 = vst.msk [vmem:[%s4924_s6 + $0x3a] sm:$0x1] %vm516_vm4, %v3303_v12  ;;  %3312 = vst.msk [vmem:[%s4924_s6 + $0x5a] sm:$0x1] %vm516_vm4, %v3304_v13 }
 0x2a4   : > { %v3336_v21 = vrot.slane %v3322_v14, %v4916_v57  ;;  %v3337_v22 = vcombine.high %v3329_v15, %v3329_v15  ;;  %3343 = vst.msk [vmem:[%s4924_s6 + $0x1b] sm:$0x1] %vm516_vm4, %v3329_v15  ;;  %v3518_v23 = vrot.slane %v3504_v16, %v4916_v57  ;;  %v3519_v24 = vcombine.high %v3511_v17, %v3511_v17 }
 0x2a5   : > { %3525 = vst.msk [vmem:[%s4924_s6 + $0x1c] sm:$0x1] %vm516_vm4, %v3511_v17  ;;  %v3537_v54 = vcombine.high %v3536_v18, %v3536_v18  ;;  %v3544_v25 = vrot.slane %v3536_v18, %v4916_v57  ;;  %3313 = vst.msk [vmem:[%s4924_s6 + $0x7a] sm:$0x1] %vm516_vm4, %v3305_v20  ;;  %v3718_v27 = vrot.slane %v3710_v19, %v4916_v57 }
 0x2a6   : > { %v3338_v26 = vcombine.high %v3336_v21, %v3336_v21  ;;  %3344 = vst.msk [vmem:[%s4924_s6 + $0x3b] sm:$0x1] %vm516_vm4, %v3336_v21  ;;  %3345 = vst.msk [vmem:[%s4924_s6 + $0x5b] sm:$0x1] %vm516_vm4, %v3337_v22  ;;  %v3744_v28 = vcombine.high %v3710_v19, %v3710_v19  ;;  %v3520_v29 = vcombine.high %v3518_v23, %v3518_v23 }
 0x2a7   : > { %3526 = vst.msk [vmem:[%s4924_s6 + $0x3c] sm:$0x1] %vm516_vm4, %v3518_v23  ;;  %3527 = vst.msk [vmem:[%s4924_s6 + $0x5c] sm:$0x1] %vm516_vm4, %v3519_v24  ;;  %v3551_v30 = vrot.slane %v3537_v54, %v4916_v57  ;;  %v3552_v31 = vcombine.high %v3544_v25, %v3544_v25  ;;  %v3719_v32 = vcombine.high %v3718_v27, %v3718_v27 }
 0x2a8   : > { %3558 = vst.msk [vmem:[%s4924_s6 + $0x1d] sm:$0x1] %vm516_vm4, %v3544_v25  ;;  %3346 = vst.msk [vmem:[%s4924_s6 + $0x7b] sm:$0x1] %vm516_vm4, %v3338_v26  ;;  %v3726_v33 = vrot.slane %v3718_v27, %v4916_v57  ;;  %v3751_v34 = vrot.slane %v3744_v28, %v4916_v57 }
 0x2a9   : > { %3528 = vst.msk [vmem:[%s4924_s6 + $0x7c] sm:$0x1] %vm516_vm4, %v3520_v29  ;;  %v3553_v35 = vcombine.high %v3551_v30, %v3551_v30  ;;  %3559 = vst.msk [vmem:[%s4924_s6 + $0x3d] sm:$0x1] %vm516_vm4, %v3551_v30  ;;  %v3733_v36 = vrot.slane %v3719_v32, %v4916_v57 }
 0x2aa   : > { %3560 = vst.msk [vmem:[%s4924_s6 + $0x5d] sm:$0x1] %vm516_vm4, %v3552_v31  ;;  %v3734_v37 = vcombine.high %v3726_v33, %v3726_v33  ;;  %3740 = vst.msk [vmem:[%s4924_s6 + $0x1e] sm:$0x1] %vm516_vm4, %v3726_v33  ;;  %v3752_v38 = vcombine.high %v3751_v34, %v3751_v34  ;;  %v3759_v39 = vrot.slane %v3751_v34, %v4916_v57 }
 0x2ab   : > { %3561 = vst.msk [vmem:[%s4924_s6 + $0x7d] sm:$0x1] %vm516_vm4, %v3553_v35  ;;  %v3735_v40 = vcombine.high %v3733_v36, %v3733_v36  ;;  %3741 = vst.msk [vmem:[%s4924_s6 + $0x3e] sm:$0x1] %vm516_vm4, %v3733_v36 }
 0x2ac   : > { %3742 = vst.msk [vmem:[%s4924_s6 + $0x5e] sm:$0x1] %vm516_vm4, %v3734_v37  ;;  %v3766_v41 = vrot.slane %v3752_v38, %v4916_v57  ;;  %v3767_v42 = vcombine.high %v3759_v39, %v3759_v39  ;;  %3773 = vst.msk [vmem:[%s4924_s6 + $0x1f] sm:$0x1] %vm516_vm4, %v3759_v39 }
 0x2ad   : > { %3743 = vst.msk [vmem:[%s4924_s6 + $0x7e] sm:$0x1] %vm516_vm4, %v3735_v40 }
 0x2ae   : > { %v3768_v43 = vcombine.high %v3766_v41, %v3766_v41  ;;  %3774 = vst.msk [vmem:[%s4924_s6 + $0x3f] sm:$0x1] %vm516_vm4, %v3766_v41  ;;  %3775 = vst.msk [vmem:[%s4924_s6 + $0x5f] sm:$0x1] %vm516_vm4, %v3767_v42 }
 0x2b0   : > { %3776 = vst.msk [vmem:[%s4924_s6 + $0x7f] sm:$0x1] %vm516_vm4, %v3768_v43 }
 0x2b1   : > { %4472 = shalt.err (!%p4469_p6)
}
 0x2b2   : > { %s4473_s13 = scalar_lea.hbm %s5286_s21, 2048  ;;  %s4477_s25 = scalar_lea.hbm %s5349_s4, 4096 }
 0x2b3   : > { %p4474_p4 = scmp.ne.s32.totalorder %s5286_s21, %s4473_s13  ;;  %p4478_p1 = scmp.lt.u32.totalorder %s5286_s21, %s5349_s4 }
 0x2b4   : > { %p4479_p2 = scmp.lt.u32.totalorder %s4477_s25, %s4473_s13  ;;  %p4481_p8 = scmp.lt.u32.totalorder %s4473_s13, %s5286_s21 }
 0x2b5   : > { %p4475_p10 = pnand %p4474_p4, %p5358_p9 }
 0x2b6   : > { %p4480_p5 = por %p4479_p2, %p4478_p1 }
 0x2b7   : > { %p4476_p12 = pneg %p4475_p10 }
 0x2b8   : > { %p4482_p11 = por %p4481_p8, %p4480_p5 }
 0x2ba   : > { %p4483_p0 = pnand %p4482_p11, %p4476_p12 }
 0x2bc   : > { %4486 = shalt.err (!%p4483_p0)
}
 0x2bd   : > { %s4557_s5 = smov 128   ;;  %s4558_s8 = smov 8  }
 0x2be   : > { %4353 = dma.vmem_to_hbm [thread:$0]  (%p5358_p9), %s5288_s7, 2048, %s5286_s21, %s3778_s18, %s4557_s5, %s4557_s5, %s4558_s8  }
 0x2bf PF: > { %s3808_s9 = sand.u32 1, %s4521_s15   ;;  %p5359_p7 = scmp.ne.s32.totalorder %s5354_s30, 0 }
 0x2c0   : > { %p5360_p13 = scmp.ge.s32.totalorder %s4541_s20, 2  ;;  %s3809_s22 = scalar_lea.sflag [#allocation4], %s3808_s9 }
 0x2c2   : > { %p4360_p3 = pnand %p5360_p13, %p5359_p7 }
 0x2c4   : > { %4516 = dma.done.wait (!%p4360_p3), %s3809_s22, 2048  }
 0x2c5   : > { %4518 = vsyncadd (!%p4360_p3), %s3809_s22, 4294965248  ;;  %s20_s20 = sadd.s32 1, %s4541_s20   ;;  %s5361_s15 = smov %s4525_s16 }
 0x2c6   : > { %p17_p6 = scmp.ge.s32.totalorder %s20_s20, 4   ;;  %s5362_s16 = smov %s4529_s17 }
 0x2c7   : > { %s5363_s17 = smov %s4640_s29  ;;  %s5364_s18 = smov %s4537_s19 }
 0x2c8   : > { %s5365_s19 = smov %s5367_s23  ;;  %19 = sbr.rel (!%p17_p6) target bundleno = 6 (0x6), region = 82 }
 0x2cf   :  { %3814 = vsyncpa [#allocation3], 1 }
 0x2d0   :  { %3816 = vsyncpa [#allocation3 + $0x1], 1 }
 0x2d1   :  { %3817 = vsyncpa [#allocation4], 1 }
 0x2d2   :  { %3819 = vsyncpa [#allocation4 + $0x1], 1 }

</bundles_post_ra>
